<compile_context>
chip_gen: v6e
topology: v6e:2x2x1
jax: 0.10.0
libtpu: 0.0.40
codegen_flags: <defaults>
</compile_context>

<pallas_src>
import math
import functools

import jax
import jax.numpy as jnp
from jax.experimental import pallas as pl
from jax.experimental.pallas import tpu as pltpu


# --------------------------------------------------------------------------
# Config (small, synthetic)
# --------------------------------------------------------------------------
class Config:
    hidden_size = 32
    num_attention_heads = 4
    intermediate_size = 128
    max_position_embeddings = 64
    rotary_pct = 0.25
    rotary_emb_base = 10000
    layer_norm_eps = 1e-5
    use_parallel_residual = True
    hidden_act = "gelu_fast"   # -> tanh-approximate gelu in the reference code


_GELU_C = math.sqrt(2.0 / math.pi)
_NEG_BIG = -1e30  # large finite negative (avoids -inf - -inf NaNs)


# --------------------------------------------------------------------------
# Generation-aware tile / VMEM preferences
# --------------------------------------------------------------------------
@functools.lru_cache(maxsize=None)
def _tpu_prefs():
    vmem_cap = 128 * 1024 * 1024
    try:
        vmem_cap = int(pltpu.get_tpu_info().vmem_capacity_bytes)
    except Exception:
        pass
    if vmem_cap <= 64 * 1024 * 1024:
        # v7x-class: 64 MiB VMEM per TensorCore -> smaller tiles, tighter limit.
        return dict(tm=128, tn=256, tq=128, tkv=256,
                    vmem_limit=int(vmem_cap * 3 // 4))
    # v5e / v6e: 128 MiB VMEM -> large tiles reach the HBM roofline.
    return dict(tm=256, tn=512, tq=256, tkv=512,
                vmem_limit=96 * 1024 * 1024)


def _pick_tile(dim, preferred, align):
    """Largest multiple of `align` that divides `dim` and is <= preferred,
    falling back to the full dim (keeps tiny shapes legal under (8,128))."""
    if dim <= preferred:
        return dim
    t = (preferred // align) * align
    while t >= align:
        if dim % t == 0:
            return t
        t -= align
    return dim


def _pick_m_tile(M, preferred):
    # Keep >=2 M-tiles when possible so the leading "parallel" axis can be
    # sharded across TensorCores.
    pref = min(preferred, max(8, M // 2))
    return _pick_tile(M, pref, 8)


# --------------------------------------------------------------------------
# Kernel bodies
# --------------------------------------------------------------------------
def _ln_qkv_rope_kernel(x_ref, g_ref, bln_ref, wq_ref, wk_ref, wv_ref,
                        bq_ref, bk_ref, bv_ref, cos_ref, sin_ref, rm_ref,
                        q_out, k_out, v_out, xn_scr, *, eps):
    # Grid (B, Sq, nh), nh innermost ("arbitrary"): LayerNorm of this row block
    # is computed once (h == 0) into a bf16 scratch and reused for every head.
    h = pl.program_id(2)

    @pl.when(h == 0)
    def _():
        x = x_ref[0].astype(jnp.float32)                       # (tq, H)
        mu = jnp.mean(x, axis=-1, keepdims=True)
        var = jnp.mean((x - mu) ** 2, axis=-1, keepdims=True)
        xn = (x - mu) * jax.lax.rsqrt(var + eps) * g_ref[...] + bln_ref[...]
        xn_scr[...] = xn.astype(xn_scr.dtype)                  # single bf16 cast

    xn = xn_scr[...]                                           # (tq, H) bf16
    q = jnp.dot(xn, wq_ref[0], preferred_element_type=jnp.float32) + bq_ref[0]
    k = jnp.dot(xn, wk_ref[0], preferred_element_type=jnp.float32) + bk_ref[0]
    v = jnp.dot(xn, wv_ref[0], preferred_element_type=jnp.float32) + bv_ref[0]

    # GPT-NeoX rotate_half via a tiny host-built [hd, hd] rotation matrix:
    # rope(x) = x*cos + (x @ R)*sin   (cos=1 / sin=0 past rotary_ndims).
    cosf = cos_ref[0].astype(jnp.float32)                      # (tq, hd)
    sinf = sin_ref[0].astype(jnp.float32)
    R = rm_ref[...]
    q = q * cosf + jnp.dot(q, R, preferred_element_type=jnp.float32) * sinf
    k = k * cosf + jnp.dot(k, R, preferred_element_type=jnp.float32) * sinf

    q_out[0, 0] = q.astype(q_out.dtype)
    k_out[0, 0] = k.astype(k_out.dtype)
    v_out[0, 0] = v.astype(v_out.dtype)


def _flash_attn_dense_kernel(q_ref, k_ref, v_ref, wd_ref, bd_ref, o_ref,
                             m_scr, l_scr, acc_scr, oacc_scr):
    # Grid (B, Sq, nh, Skv); nh and Skv are reduction axes.
    qi = pl.program_id(1)
    h = pl.program_id(2)
    ki = pl.program_id(3)
    nh = pl.num_programs(2)
    nkv = pl.num_programs(3)

    tq = q_ref.shape[2]
    tkv = k_ref.shape[2]
    q_start = qi * tq
    kv_start = ki * tkv

    @pl.when((h == 0) & (ki == 0))
    def _():
        oacc_scr[...] = jnp.zeros_like(oacc_scr)

    @pl.when(ki == 0)
    def _():
        m_scr[...] = jnp.full_like(m_scr, _NEG_BIG)
        l_scr[...] = jnp.zeros_like(l_scr)
        acc_scr[...] = jnp.zeros_like(acc_scr)

    # Skip KV tiles that are entirely in the future of this query tile.
    # TODO(synk): arbitrary (padding / non-causal) attention_mask would need an
    # extra per-key mask input; the in-register mask here is strictly causal.
    @pl.when(kv_start <= q_start + (tq - 1))
    def _():
        q = q_ref[0, 0]                                        # (tq, hd) bf16
        k = k_ref[0, 0]                                        # (tkv, hd) bf16
        # 1/sqrt(hd) scale was folded into W_q host-side.
        s = jax.lax.dot_general(q, k, (((1,), (1,)), ((), ())),
                                preferred_element_type=jnp.float32)
        row = q_start + jax.lax.broadcasted_iota(jnp.int32, (tq, tkv), 0)
        col = kv_start + jax.lax.broadcasted_iota(jnp.int32, (tq, tkv), 1)
        s = jnp.where(col > row, _NEG_BIG, s)

        m_prev = m_scr[...]
        m_new = jnp.maximum(m_prev, jnp.max(s, axis=-1, keepdims=True))
        alpha = jnp.exp(m_prev - m_new)
        p = jnp.exp(s - m_new)
        l_scr[...] = alpha * l_scr[...] + jnp.sum(p, axis=-1, keepdims=True)
        acc_scr[...] = alpha * acc_scr[...] + jnp.dot(
            p.astype(jnp.bfloat16), v_ref[0, 0],
            preferred_element_type=jnp.float32)
        m_scr[...] = m_new

    # Per-head epilogue: normalize and immediately project through W_dense[h]
    # into the persistent (tq, H) accumulator (fused dense projection).
    @pl.when(ki == nkv - 1)
    def _():
        o_h = acc_scr[...] * pl.reciprocal(l_scr[...], approx=True)
        oacc_scr[...] += jnp.dot(o_h.astype(jnp.bfloat16), wd_ref[0],
                                 preferred_element_type=jnp.float32)

    # Final lane-dense store: one (tq, H) block per (b, q-tile).
    @pl.when((ki == nkv - 1) & (h == nh - 1))
    def _():
        o_ref[0] = (oacc_scr[...] + bd_ref[...]).astype(o_ref.dtype)


def _ln_mlp_residual_kernel(*refs, eps, has_extra):
    if has_extra:
        (x_ref, g_ref, bln_ref, extra_ref, w1_ref, b1_ref, w2_ref, b2_ref,
         o_ref, xn_scr, acc_ref) = refs
    else:
        (x_ref, g_ref, bln_ref, w1_ref, b1_ref, w2_ref, b2_ref,
         o_ref, xn_scr, acc_ref) = refs
        extra_ref = None

    j = pl.program_id(1)

    @pl.when(j == 0)
    def _():
        acc_ref[...] = jnp.zeros_like(acc_ref)
        x = x_ref[...].astype(jnp.float32)
        mu = jnp.mean(x, axis=-1, keepdims=True)
        var = jnp.mean((x - mu) ** 2, axis=-1, keepdims=True)
        xn = (x - mu) * jax.lax.rsqrt(var + eps) * g_ref[...] + bln_ref[...]
        xn_scr[...] = xn.astype(xn_scr.dtype)       # LN hoisted, bf16 once

    hcur = jnp.dot(xn_scr[...], w1_ref[...],
                   preferred_element_type=jnp.float32) + b1_ref[...]
    hcur = 0.5 * hcur * (1.0 + jnp.tanh(_GELU_C * (hcur + 0.044715 * hcur
                                                   * hcur * hcur)))
    acc_ref[...] += jnp.dot(hcur.astype(jnp.bfloat16), w2_ref[...],
                            preferred_element_type=jnp.float32)

    @pl.when(j == pl.num_programs(1) - 1)
    def _():
        out = acc_ref[...] + b2_ref[...] + x_ref[...].astype(jnp.float32)
        if has_extra:
            out = out + extra_ref[...].astype(jnp.float32)
        o_ref[...] = out.astype(o_ref.dtype)


# --------------------------------------------------------------------------
# Pallas wrappers
# --------------------------------------------------------------------------
def ln_qkv_rope_pallas(x, gamma, beta, wq, wk, wv, bq, bk, bv,
                       cosf, sinf, rot_mat, *, eps):
    """x: [B, S, H]; per-head weights [nh, H, hd]; returns bf16 q, k, v of
    shape [B, nh, S, hd] (rotary + attention scale already applied to q/k)."""
    B, S, H = x.shape
    nh, _, hd = wq.shape
    prefs = _tpu_prefs()
    tq = _pick_tile(S, prefs["tq"], 8)
    grid = (B, S // tq, nh)
    kernel = functools.partial(_ln_qkv_rope_kernel, eps=eps)
    out_spec = pl.BlockSpec((1, 1, tq, hd), lambda b, qi, h: (b, h, qi, 0))
    out_sds = jax.ShapeDtypeStruct((B, nh, S, hd), jnp.bfloat16)
    return pl.pallas_call(
        kernel,
        out_shape=(out_sds, out_sds, out_sds),
        grid=grid,
        in_specs=[
            pl.BlockSpec((1, tq, H), lambda b, qi, h: (b, qi, 0)),   # x
            pl.BlockSpec((1, H), lambda b, qi, h: (0, 0)),           # ln gamma
            pl.BlockSpec((1, H), lambda b, qi, h: (0, 0)),           # ln beta
            pl.BlockSpec((1, H, hd), lambda b, qi, h: (h, 0, 0)),    # w_q[h]
            pl.BlockSpec((1, H, hd), lambda b, qi, h: (h, 0, 0)),    # w_k[h]
            pl.BlockSpec((1, H, hd), lambda b, qi, h: (h, 0, 0)),    # w_v[h]
            pl.BlockSpec((1, 1, hd), lambda b, qi, h: (h, 0, 0)),    # b_q[h]
            pl.BlockSpec((1, 1, hd), lambda b, qi, h: (h, 0, 0)),    # b_k[h]
            pl.BlockSpec((1, 1, hd), lambda b, qi, h: (h, 0, 0)),    # b_v[h]
            pl.BlockSpec((1, tq, hd), lambda b, qi, h: (b, qi, 0)),  # cos
            pl.BlockSpec((1, tq, hd), lambda b, qi, h: (b, qi, 0)),  # sin
            pl.BlockSpec((hd, hd), lambda b, qi, h: (0, 0)),         # rot matrix
        ],
        out_specs=(out_spec, out_spec, out_spec),
        scratch_shapes=[pltpu.VMEM((tq, H), jnp.bfloat16)],
        compiler_params=pltpu.CompilerParams(
            dimension_semantics=("parallel", "parallel", "arbitrary"),
            vmem_limit_bytes=prefs["vmem_limit"]),
    )(x, gamma, beta, wq, wk, wv, bq, bk, bv, cosf, sinf, rot_mat)


def flash_attention_dense_pallas(q, k, v, wd, bd, *, out_dtype):
    """q/k/v: [B, nh, S, hd] bf16; wd: [nh, hd, H] bf16; bd: [1, H] f32.
    Returns attention output already projected through the dense layer,
    shape [B, S, H] (lane-dense)."""
    B, nh, S, hd = q.shape
    H = wd.shape[-1]
    prefs = _tpu_prefs()
    tq = _pick_tile(S, prefs["tq"], 8)
    tkv = _pick_tile(S, prefs["tkv"], 8)
    grid = (B, S // tq, nh, S // tkv)
    return pl.pallas_call(
        _flash_attn_dense_kernel,
        out_shape=jax.ShapeDtypeStruct((B, S, H), out_dtype),
        grid=grid,
        in_specs=[
            pl.BlockSpec((1, 1, tq, hd), lambda b, qi, h, ki: (b, h, qi, 0)),
            pl.BlockSpec((1, 1, tkv, hd), lambda b, qi, h, ki: (b, h, ki, 0)),
            pl.BlockSpec((1, 1, tkv, hd), lambda b, qi, h, ki: (b, h, ki, 0)),
            pl.BlockSpec((1, hd, H), lambda b, qi, h, ki: (h, 0, 0)),
            pl.BlockSpec((1, H), lambda b, qi, h, ki: (0, 0)),
        ],
        out_specs=pl.BlockSpec((1, tq, H), lambda b, qi, h, ki: (b, qi, 0)),
        scratch_shapes=[
            pltpu.VMEM((tq, 1), jnp.float32),    # running max
            pltpu.VMEM((tq, 1), jnp.float32),    # running sum
            pltpu.VMEM((tq, hd), jnp.float32),   # per-head acc
            pltpu.VMEM((tq, H), jnp.float32),    # dense-projected acc
        ],
        compiler_params=pltpu.CompilerParams(
            dimension_semantics=("parallel", "parallel", "arbitrary",
                                 "arbitrary"),
            vmem_limit_bytes=prefs["vmem_limit"]),
    )(q, k, v, wd, bd)


def ln_mlp_residual_pallas(x, gamma, beta, w1, b1, w2, b2, *, eps, extra=None):
    """gelu_tanh(LN(x) @ w1 + b1) @ w2 + b2 [+ extra] + x."""
    M, H = x.shape
    I = w1.shape[-1]
    prefs = _tpu_prefs()
    tm = _pick_m_tile(M, prefs["tm"])
    ti = _pick_tile(I, prefs["tn"], 128)
    grid = (M // tm, I // ti)
    has_extra = extra is not None
    kernel = functools.partial(_ln_mlp_residual_kernel, eps=eps,
                               has_extra=has_extra)

    in_specs = [
        pl.BlockSpec((tm, H), lambda i, j: (i, 0)),   # x (LN input + residual)
        pl.BlockSpec((1, H), lambda i, j: (0, 0)),    # ln gamma
        pl.BlockSpec((1, H), lambda i, j: (0, 0)),    # ln beta
    ]
    args = [x, gamma, beta]
    if has_extra:
        in_specs.append(pl.BlockSpec((tm, H), lambda i, j: (i, 0)))
        args.append(extra)
    in_specs += [
        pl.BlockSpec((H, ti), lambda i, j: (0, j)),   # w1
        pl.BlockSpec((1, ti), lambda i, j: (0, j)),   # b1
        pl.BlockSpec((ti, H), lambda i, j: (j, 0)),   # w2
        pl.BlockSpec((1, H), lambda i, j: (0, 0)),    # b2
    ]
    args += [w1, b1, w2, b2]

    return pl.pallas_call(
        kernel,
        out_shape=jax.ShapeDtypeStruct((M, H), x.dtype),
        grid=grid,
        in_specs=in_specs,
        out_specs=pl.BlockSpec((tm, H), lambda i, j: (i, 0)),
        scratch_shapes=[pltpu.VMEM((tm, H), jnp.bfloat16),   # hoisted LN
                        pltpu.VMEM((tm, H), jnp.float32)],   # MLP accumulator
        compiler_params=pltpu.CompilerParams(
            dimension_semantics=("parallel", "arbitrary"),
            vmem_limit_bytes=prefs["vmem_limit"]),
    )(*args)


# --------------------------------------------------------------------------
# Rotary cache + host-side parameter prep (done once at load time)
# --------------------------------------------------------------------------
def build_rotary_cache(rotary_ndims, max_pos, base):
    inv_freq = 1.0 / (base ** (jnp.arange(0, rotary_ndims, 2, dtype=jnp.float32)
                               / rotary_ndims))
    t = jnp.arange(max_pos, dtype=jnp.float32)
    freqs = jnp.einsum("i,j->ij", t, inv_freq)
    emb = jnp.concatenate([freqs, freqs], axis=-1)  # [max_pos, rotary_ndims]
    return jnp.cos(emb), jnp.sin(emb)


def prepare_layer_params(params, cfg, weight_dtype=jnp.bfloat16):
    """One-time host-side prep: per-head weight layouts, bf16 weight casts,
    attention scale folded into the query projection, rotate_half matrix."""
    H = cfg.hidden_size
    nh = cfg.num_attention_heads
    hd = H // nh
    rot = int(hd * cfg.rotary_pct)
    inv_norm = 1.0 / math.sqrt(hd)

    # NeoX qkv columns are ordered (head, [q | k | v], hd) -> split per head.
    w = params["w_qkv"].reshape(H, nh, 3, hd)
    wq = jnp.transpose(w[:, :, 0, :], (1, 0, 2))   # [nh, H, hd]
    wk = jnp.transpose(w[:, :, 1, :], (1, 0, 2))
    wv = jnp.transpose(w[:, :, 2, :], (1, 0, 2))
    b3 = params["b_qkv"].reshape(nh, 3, hd)
    bq = b3[:, 0, :][:, None, :]                   # [nh, 1, hd]
    bk = b3[:, 1, :][:, None, :]
    bv = b3[:, 2, :][:, None, :]

    # Fold 1/sqrt(head_dim) into the query projection (rope is linear in q).
    wq = wq * inv_norm
    bq = bq * inv_norm

    # rotate_half on the first `rot` dims as a [hd, hd] matrix.
    half = rot // 2
    ii = jnp.arange(hd)[:, None]   # input dim
    jj = jnp.arange(hd)[None, :]   # output dim
    rot_mat = jnp.where((jj < half) & (ii == jj + half), -1.0,
                        jnp.where((jj >= half) & (jj < rot) & (ii == jj - half),
                                  1.0, 0.0)).astype(jnp.float32)

    wd = params["w_dense"].reshape(nh, hd, H)      # [nh, hd, H]

    f32 = jnp.float32
    return {
        "ln1_g": params["ln1_g"].astype(f32), "ln1_b": params["ln1_b"].astype(f32),
        "ln2_g": params["ln2_g"].astype(f32), "ln2_b": params["ln2_b"].astype(f32),
        "wq_h": wq.astype(weight_dtype), "wk_h": wk.astype(weight_dtype),
        "wv_h": wv.astype(weight_dtype),
        "bq_h": bq.astype(f32), "bk_h": bk.astype(f32), "bv_h": bv.astype(f32),
        "wd_h": wd.astype(weight_dtype), "b_dense": params["b_dense"].astype(f32),
        "w_h4h": params["w_h4h"].astype(weight_dtype),
        "b_h4h": params["b_h4h"].astype(f32),
        "w_4hh": params["w_4hh"].astype(weight_dtype),
        "b_4hh": params["b_4hh"].astype(f32),
        "cos_cached": params["cos_cached"], "sin_cached": params["sin_cached"],
        "rot_mat": rot_mat,
    }


# --------------------------------------------------------------------------
# Full layer forward (use_cache=False, no head_mask)
# --------------------------------------------------------------------------
def gpt_neox_layer_pallas(prep, hidden_states, position_ids, attention_mask, cfg):
    B, S, H = hidden_states.shape
    nh = cfg.num_attention_heads
    hd = H // nh
    rot = int(hd * cfg.rotary_pct)
    eps = cfg.layer_norm_eps

    # Rotary cos/sin gathered per position, padded to head_size (cos=1 / sin=0
    # past rotary_ndims so the rope formula is a pass-through there).
    cos = prep["cos_cached"][position_ids]                     # [B, S, rot]
    sin = prep["sin_cached"][position_ids]
    cosf = jnp.concatenate([cos, jnp.ones((B, S, hd - rot), cos.dtype)], axis=-1)
    sinf = jnp.concatenate([sin, jnp.zeros((B, S, hd - rot), sin.dtype)], axis=-1)

    # ---- fused LN1 + per-head QKV projection + rotary (Pallas) ----
    q, k, v = ln_qkv_rope_pallas(
        hidden_states, prep["ln1_g"], prep["ln1_b"],
        prep["wq_h"], prep["wk_h"], prep["wv_h"],
        prep["bq_h"], prep["bk_h"], prep["bv_h"],
        cosf, sinf, prep["rot_mat"], eps=eps)                  # [B, nh, S, hd]

    # ---- flash attention fused with the dense projection (Pallas) ----
    # TODO(synk): attention_mask is unused here — the kernel builds the standard
    # causal mask in-register; arbitrary padding masks would need an extra
    # per-key mask input streamed per (b, kv-tile).
    attn_dense = flash_attention_dense_pallas(
        q, k, v, prep["wd_h"], prep["b_dense"],
        out_dtype=hidden_states.dtype)                         # [B, S, H]

    x2d = hidden_states.reshape(B * S, H)
    attn2d = attn_dense.reshape(B * S, H)

    # ---- fused LN2 + MLP + residual epilogue (Pallas) ----
    if cfg.use_parallel_residual:
        # hidden = mlp(ln2(x)) + attn + x
        out2d = ln_mlp_residual_pallas(x2d, prep["ln2_g"], prep["ln2_b"],
                                       prep["w_h4h"], prep["b_h4h"],
                                       prep["w_4hh"], prep["b_4hh"],
                                       eps=eps, extra=attn2d)
    else:
        # hidden = mlp(ln2(attn + x)) + (attn + x)   (no zeros tensor streamed)
        attn_res = attn2d + x2d
        out2d = ln_mlp_residual_pallas(attn_res, prep["ln2_g"], prep["ln2_b"],
                                       prep["w_h4h"], prep["b_h4h"],
                                       prep["w_4hh"], prep["b_4hh"],
                                       eps=eps, extra=None)
    return out2d.reshape(B, S, H)


# --------------------------------------------------------------------------
# Pure-jnp f32 reference (same math, no Pallas) for verification
# --------------------------------------------------------------------------
def _apply_rotary_ref(q, k, position_ids, cos_cached, sin_cached, rot):
    cos = cos_cached[position_ids][:, None, :, :]
    sin = sin_cached[position_ids][:, None, :, :]

    def rotate(x):
        x_rot, x_pass = x[..., :rot], x[..., rot:]
        half = rot // 2
        x_rotated = jnp.concatenate([-x_rot[..., half:], x_rot[..., :half]], axis=-1)
        x_emb = x_rot * cos + x_rotated * sin
        return jnp.concatenate([x_emb, x_pass], axis=-1)

    return rotate(q), rotate(k)


def gpt_neox_layer_ref(params, hidden_states, position_ids, attention_mask, cfg):
    B, S, H = hidden_states.shape
    nh = cfg.num_attention_heads
    hd = H // nh
    rot = int(hd * cfg.rotary_pct)
    inv_norm_factor = 1.0 / math.sqrt(hd)
    eps = cfg.layer_norm_eps

    def ln(x, g, b):
        mean = jnp.mean(x, axis=-1, keepdims=True)
        var = jnp.mean((x - mean) ** 2, axis=-1, keepdims=True)
        return (x - mean) / jnp.sqrt(var + eps) * g + b

    x2d = hidden_states.reshape(B * S, H)
    ln1 = ln(x2d, params["ln1_g"], params["ln1_b"])
    qkv = ln1 @ params["w_qkv"] + params["b_qkv"]
    qkv = qkv.reshape(B, S, nh, 3 * hd).transpose(0, 2, 1, 3)
    q, k, v = qkv[..., :hd], qkv[..., hd:2 * hd], qkv[..., 2 * hd:]
    q, k = _apply_rotary_ref(q, k, position_ids,
                             params["cos_cached"], params["sin_cached"], rot)

    scores = jnp.einsum("bhqd,bhkd->bhqk", q, k) * inv_norm_factor
    scores = jnp.where(attention_mask[:, None, :, :],
                       jnp.finfo(jnp.float32).min, scores)
    probs = jax.nn.softmax(scores, axis=-1)
    attn = jnp.einsum("bhqk,bhkd->bhqd", probs, v)
    attn = attn.transpose(0, 2, 1, 3).reshape(B * S, H)
    attn_out = attn @ params["w_dense"] + params["b_dense"]

    ln2 = ln(x2d, params["ln2_g"], params["ln2_b"])
    h = ln2 @ params["w_h4h"] + params["b_h4h"]
    h = 0.5 * h * (1.0 + jnp.tanh(_GELU_C * (h + 0.044715 * h ** 3)))
    mlp_out = h @ params["w_4hh"] + params["b_4hh"]

    out = mlp_out + attn_out + x2d
    return out.reshape(B, S, H)


# --------------------------------------------------------------------------
# Main
# --------------------------------------------------------------------------
if __name__ == "__main__":
    cfg = Config()
    B, S = 2, 8
    H = cfg.hidden_size
    nh = cfg.num_attention_heads
    hd = H // nh
    rot = int(hd * cfg.rotary_pct)
    I = cfg.intermediate_size

    key = jax.random.PRNGKey(0)
    keys = jax.random.split(key, 12)

    def rnd(k_, shape, scale=0.02):
        return (scale * jax.random.normal(k_, shape)).astype(jnp.float32)

    cos_cached, sin_cached = build_rotary_cache(
        rot, cfg.max_position_embeddings, cfg.rotary_emb_base)

    params = {
        "ln1_g": 1.0 + rnd(keys[0], (1, H)),
        "ln1_b": rnd(keys[1], (1, H)),
        "ln2_g": 1.0 + rnd(keys[2], (1, H)),
        "ln2_b": rnd(keys[3], (1, H)),
        "w_qkv": rnd(keys[4], (H, 3 * H)),
        "b_qkv": rnd(keys[5], (1, 3 * H)),
        "w_dense": rnd(keys[6], (H, H)),
        "b_dense": rnd(keys[7], (1, H)),
        "w_h4h": rnd(keys[8], (H, I)),
        "b_h4h": rnd(keys[9], (1, I)),
        "w_4hh": rnd(keys[10], (I, H)),
        "b_4hh": rnd(keys[11], (1, H)),
        "cos_cached": cos_cached,
        "sin_cached": sin_cached,
    }

    hidden_states = jax.random.normal(
        jax.random.PRNGKey(42), (B, S, H)).astype(jnp.float32)
    position_ids = jnp.broadcast_to(jnp.arange(S, dtype=jnp.int32), (B, S))
    # boolean causal mask: True = masked (matches torch.where(mask, min, scores))
    row = jnp.arange(S)[:, None]
    col = jnp.arange(S)[None, :]
    attention_mask = jnp.broadcast_to(col > row, (B, S, S))

    prep = prepare_layer_params(params, cfg)     # one-time host-side weight prep
    fwd = jax.jit(functools.partial(gpt_neox_layer_pallas, cfg=cfg))
    out = fwd(prep, hidden_states, position_ids, attention_mask)
    out = jax.block_until_ready(out)

    ref = gpt_neox_layer_ref(params, hidden_states, position_ids,
                             attention_mask, cfg)
    assert out.shape == (B, S, H)
    # bf16 MXU inputs (f32 accumulation / f32 elementwise) vs f32 reference.
    assert jnp.allclose(out, ref, atol=1e-2, rtol=1e-2), "mismatch vs jnp reference"

    print("KERNEL_OK")
</pallas_src>

<mosaic_0001>
module attributes {stable_mosaic.version = 11 : i64} {
  func.func @_ln_qkv_rope_kernel(%arg0: i32, %arg1: i32, %arg2: i32, %arg3: memref<1x8x32xf32, #tpu.memory_space<vmem>>, %arg4: memref<1x32xf32, #tpu.memory_space<vmem>>, %arg5: memref<1x32xf32, #tpu.memory_space<vmem>>, %arg6: memref<1x32x8xbf16, #tpu.memory_space<vmem>>, %arg7: memref<1x32x8xbf16, #tpu.memory_space<vmem>>, %arg8: memref<1x32x8xbf16, #tpu.memory_space<vmem>>, %arg9: memref<1x1x8xf32, #tpu.memory_space<vmem>>, %arg10: memref<1x1x8xf32, #tpu.memory_space<vmem>>, %arg11: memref<1x1x8xf32, #tpu.memory_space<vmem>>, %arg12: memref<1x8x8xf32, #tpu.memory_space<vmem>>, %arg13: memref<1x8x8xf32, #tpu.memory_space<vmem>>, %arg14: memref<8x8xf32, #tpu.memory_space<vmem>>, %arg15: memref<1x1x8x8xbf16, #tpu.memory_space<vmem>>, %arg16: memref<1x1x8x8xbf16, #tpu.memory_space<vmem>>, %arg17: memref<1x1x8x8xbf16, #tpu.memory_space<vmem>>, %arg18: memref<8x32xbf16, #tpu.memory_space<vmem>>) attributes {dimension_semantics = [#tpu.dimension_semantics<parallel>, #tpu.dimension_semantics<parallel>, #tpu.dimension_semantics<arbitrary>], iteration_bounds = array<i64: 2, 1, 4>, scalar_prefetch = 0 : i64, scratch_operands = 1 : i64, tpu.core_type = #tpu.core_type<tc>, window_params = [{transform_indices = @transform_0, window_bounds = array<i64: 1, 8, 32>}, {pipeline_mode = #tpu.pipeline_mode<synchronous>, transform_indices = @transform_1, window_bounds = array<i64: 1, 32>}, {pipeline_mode = #tpu.pipeline_mode<synchronous>, transform_indices = @transform_2, window_bounds = array<i64: 1, 32>}, {transform_indices = @transform_3, window_bounds = array<i64: 1, 32, 8>}, {transform_indices = @transform_4, window_bounds = array<i64: 1, 32, 8>}, {transform_indices = @transform_5, window_bounds = array<i64: 1, 32, 8>}, {transform_indices = @transform_6, window_bounds = array<i64: 1, 1, 8>}, {transform_indices = @transform_7, window_bounds = array<i64: 1, 1, 8>}, {transform_indices = @transform_8, window_bounds = array<i64: 1, 1, 8>}, {transform_indices = @transform_9, window_bounds = array<i64: 1, 8, 8>}, {transform_indices = @transform_10, window_bounds = array<i64: 1, 8, 8>}, {pipeline_mode = #tpu.pipeline_mode<synchronous>, transform_indices = @transform_11, window_bounds = array<i64: 8, 8>}, {transform_indices = @transform_12, window_bounds = array<i64: 1, 1, 8, 8>}, {transform_indices = @transform_13, window_bounds = array<i64: 1, 1, 8, 8>}, {transform_indices = @transform_14, window_bounds = array<i64: 1, 1, 8, 8>}]} {
    %c0_i32 = arith.constant 0 : i32
    %0 = arith.cmpi eq, %arg2, %c0_i32 : i32
    %1 = arith.extui %0 : i1 to i32
    %c0_i32_0 = arith.constant 0 : i32
    %2 = arith.cmpi ne, %1, %c0_i32_0 : i32
    scf.if %2 {
      %c0_44 = arith.constant 0 : index
      %c0_45 = arith.constant 0 : index
      %c0_46 = arith.constant 0 : index
      %50 = vector.load %arg3[%c0_44, %c0_45, %c0_46] : memref<1x8x32xf32, #tpu.memory_space<vmem>>, vector<1x8x32xf32>
      %51 = vector.shape_cast %50 : vector<1x8x32xf32> to vector<8x32xf32>
      %cst_47 = arith.constant dense<0.000000e+00> : vector<8xf32>
      %52 = vector.multi_reduction <add>, %51, %cst_47 [1] : vector<8x32xf32> to vector<8xf32>
      %53 = vector.shape_cast %52 : vector<8xf32> to vector<8x1xf32>
      %cst_48 = arith.constant 3.200000e+01 : f32
      %54 = vector.broadcast %cst_48 : f32 to vector<8x1xf32>
      %55 = arith.divf %53, %54 : vector<8x1xf32>
      %56 = vector.broadcast %55 : vector<8x1xf32> to vector<8x32xf32>
      %57 = arith.subf %51, %56 : vector<8x32xf32>
      %58 = arith.mulf %57, %57 : vector<8x32xf32>
      %cst_49 = arith.constant dense<0.000000e+00> : vector<8xf32>
      %59 = vector.multi_reduction <add>, %58, %cst_49 [1] : vector<8x32xf32> to vector<8xf32>
      %60 = vector.shape_cast %59 : vector<8xf32> to vector<8x1xf32>
      %cst_50 = arith.constant 3.200000e+01 : f32
      %61 = vector.broadcast %cst_50 : f32 to vector<8x1xf32>
      %62 = arith.divf %60, %61 : vector<8x1xf32>
      %63 = vector.broadcast %55 : vector<8x1xf32> to vector<8x32xf32>
      %64 = arith.subf %51, %63 : vector<8x32xf32>
      %cst_51 = arith.constant 9.99999974E-6 : f32
      %65 = vector.broadcast %cst_51 : f32 to vector<8x1xf32>
      %66 = arith.addf %62, %65 : vector<8x1xf32>
      %67 = math.rsqrt %66 : vector<8x1xf32>
      %68 = vector.broadcast %67 : vector<8x1xf32> to vector<8x32xf32>
      %69 = arith.mulf %64, %68 : vector<8x32xf32>
      %c0_52 = arith.constant 0 : index
      %c0_53 = arith.constant 0 : index
      %70 = vector.load %arg4[%c0_52, %c0_53] : memref<1x32xf32, #tpu.memory_space<vmem>>, vector<1x32xf32>
      %71 = vector.broadcast %70 : vector<1x32xf32> to vector<8x32xf32>
      %72 = arith.mulf %69, %71 : vector<8x32xf32>
      %c0_54 = arith.constant 0 : index
      %c0_55 = arith.constant 0 : index
      %73 = vector.load %arg5[%c0_54, %c0_55] : memref<1x32xf32, #tpu.memory_space<vmem>>, vector<1x32xf32>
      %74 = vector.broadcast %73 : vector<1x32xf32> to vector<8x32xf32>
      %75 = arith.addf %72, %74 : vector<8x32xf32>
      %76 = arith.truncf %75 : vector<8x32xf32> to vector<8x32xbf16>
      %c0_56 = arith.constant 0 : index
      %c0_57 = arith.constant 0 : index
      %77 = vector.load %arg18[%c0_56, %c0_57] : memref<8x32xbf16, #tpu.memory_space<vmem>>, vector<8x32xbf16>
      tpu.vector_store %arg18[%c0_56, %c0_57], %76 {strides = array<i32>} : memref<8x32xbf16, #tpu.memory_space<vmem>>, vector<8x32xbf16>,
    } else {
    }
    %c0 = arith.constant 0 : index
    %c0_1 = arith.constant 0 : index
    %3 = vector.load %arg18[%c0, %c0_1] : memref<8x32xbf16, #tpu.memory_space<vmem>>, vector<8x32xbf16>
    %c0_2 = arith.constant 0 : index
    %c0_3 = arith.constant 0 : index
    %c0_4 = arith.constant 0 : index
    %4 = vector.load %arg6[%c0_2, %c0_3, %c0_4] : memref<1x32x8xbf16, #tpu.memory_space<vmem>>, vector<1x32x8xbf16>
    %5 = vector.shape_cast %4 : vector<1x32x8xbf16> to vector<32x8xbf16>
    %cst = arith.constant dense<0.000000e+00> : vector<8x8xf32>
    %6 = tpu.matmul %3, %5, %cst {dimension_numbers = #tpu.dot_dimension_numbers<[1], [0], [0], [1], [0, 0, 1, 1], [], []>} : vector<8x32xbf16>, vector<32x8xbf16>, vector<8x8xf32> -> vector<8x8xf32>
    %c0_5 = arith.constant 0 : index
    %c0_6 = arith.constant 0 : index
    %c0_7 = arith.constant 0 : index
    %7 = vector.load %arg9[%c0_5, %c0_6, %c0_7] : memref<1x1x8xf32, #tpu.memory_space<vmem>>, vector<1x1x8xf32>
    %8 = vector.shape_cast %7 : vector<1x1x8xf32> to vector<1x8xf32>
    %9 = vector.broadcast %8 : vector<1x8xf32> to vector<8x8xf32>
    %10 = arith.addf %6, %9 : vector<8x8xf32>
    %c0_8 = arith.constant 0 : index
    %c0_9 = arith.constant 0 : index
    %c0_10 = arith.constant 0 : index
    %11 = vector.load %arg7[%c0_8, %c0_9, %c0_10] : memref<1x32x8xbf16, #tpu.memory_space<vmem>>, vector<1x32x8xbf16>
    %12 = vector.shape_cast %11 : vector<1x32x8xbf16> to vector<32x8xbf16>
    %cst_11 = arith.constant dense<0.000000e+00> : vector<8x8xf32>
    %13 = tpu.matmul %3, %12, %cst_11 {dimension_numbers = #tpu.dot_dimension_numbers<[1], [0], [0], [1], [0, 0, 1, 1], [], []>} : vector<8x32xbf16>, vector<32x8xbf16>, vector<8x8xf32> -> vector<8x8xf32>
    %c0_12 = arith.constant 0 : index
    %c0_13 = arith.constant 0 : index
    %c0_14 = arith.constant 0 : index
    %14 = vector.load %arg10[%c0_12, %c0_13, %c0_14] : memref<1x1x8xf32, #tpu.memory_space<vmem>>, vector<1x1x8xf32>
    %15 = vector.shape_cast %14 : vector<1x1x8xf32> to vector<1x8xf32>
    %16 = vector.broadcast %15 : vector<1x8xf32> to vector<8x8xf32>
    %17 = arith.addf %13, %16 : vector<8x8xf32>
    %c0_15 = arith.constant 0 : index
    %c0_16 = arith.constant 0 : index
    %c0_17 = arith.constant 0 : index
    %18 = vector.load %arg8[%c0_15, %c0_16, %c0_17] : memref<1x32x8xbf16, #tpu.memory_space<vmem>>, vector<1x32x8xbf16>
    %19 = vector.shape_cast %18 : vector<1x32x8xbf16> to vector<32x8xbf16>
    %cst_18 = arith.constant dense<0.000000e+00> : vector<8x8xf32>
    %20 = tpu.matmul %3, %19, %cst_18 {dimension_numbers = #tpu.dot_dimension_numbers<[1], [0], [0], [1], [0, 0, 1, 1], [], []>} : vector<8x32xbf16>, vector<32x8xbf16>, vector<8x8xf32> -> vector<8x8xf32>
    %c0_19 = arith.constant 0 : index
    %c0_20 = arith.constant 0 : index
    %c0_21 = arith.constant 0 : index
    %21 = vector.load %arg11[%c0_19, %c0_20, %c0_21] : memref<1x1x8xf32, #tpu.memory_space<vmem>>, vector<1x1x8xf32>
    %22 = vector.shape_cast %21 : vector<1x1x8xf32> to vector<1x8xf32>
    %23 = vector.broadcast %22 : vector<1x8xf32> to vector<8x8xf32>
    %24 = arith.addf %20, %23 : vector<8x8xf32>
    %c0_22 = arith.constant 0 : index
    %c0_23 = arith.constant 0 : index
    %c0_24 = arith.constant 0 : index
    %25 = vector.load %arg12[%c0_22, %c0_23, %c0_24] : memref<1x8x8xf32, #tpu.memory_space<vmem>>, vector<1x8x8xf32>
    %26 = vector.shape_cast %25 : vector<1x8x8xf32> to vector<8x8xf32>
    %c0_25 = arith.constant 0 : index
    %c0_26 = arith.constant 0 : index
    %c0_27 = arith.constant 0 : index
    %27 = vector.load %arg13[%c0_25, %c0_26, %c0_27] : memref<1x8x8xf32, #tpu.memory_space<vmem>>, vector<1x8x8xf32>
    %28 = vector.shape_cast %27 : vector<1x8x8xf32> to vector<8x8xf32>
    %c0_28 = arith.constant 0 : index
    %c0_29 = arith.constant 0 : index
    %29 = vector.load %arg14[%c0_28, %c0_29] : memref<8x8xf32, #tpu.memory_space<vmem>>, vector<8x8xf32>
    %30 = arith.mulf %10, %26 : vector<8x8xf32>
    %cst_30 = arith.constant dense<0.000000e+00> : vector<8x8xf32>
    %31 = tpu.matmul %10, %29, %cst_30 {dimension_numbers = #tpu.dot_dimension_numbers<[1], [0], [0], [1], [0, 0, 1, 1], [], []>} : vector<8x8xf32>, vector<8x8xf32>, vector<8x8xf32> -> vector<8x8xf32>
    %32 = arith.mulf %31, %28 : vector<8x8xf32>
    %33 = arith.addf %30, %32 : vector<8x8xf32>
    %34 = arith.mulf %17, %26 : vector<8x8xf32>
    %cst_31 = arith.constant dense<0.000000e+00> : vector<8x8xf32>
    %35 = tpu.matmul %17, %29, %cst_31 {dimension_numbers = #tpu.dot_dimension_numbers<[1], [0], [0], [1], [0, 0, 1, 1], [], []>} : vector<8x8xf32>, vector<8x8xf32>, vector<8x8xf32> -> vector<8x8xf32>
    %36 = arith.mulf %35, %28 : vector<8x8xf32>
    %37 = arith.addf %34, %36 : vector<8x8xf32>
    %38 = arith.truncf %33 : vector<8x8xf32> to vector<8x8xbf16>
    %c0_32 = arith.constant 0 : index
    %c0_33 = arith.constant 0 : index
    %c0_34 = arith.constant 0 : index
    %c0_35 = arith.constant 0 : index
    %39 = vector.load %arg15[%c0_32, %c0_33, %c0_34, %c0_35] : memref<1x1x8x8xbf16, #tpu.memory_space<vmem>>, vector<1x1x8x8xbf16>
    %40 = vector.shape_cast %39 : vector<1x1x8x8xbf16> to vector<8x8xbf16>
    %41 = vector.shape_cast %38 : vector<8x8xbf16> to vector<1x1x8x8xbf16>
    tpu.vector_store %arg15[%c0_32, %c0_33, %c0_34, %c0_35], %41 {strides = array<i32>} : memref<1x1x8x8xbf16, #tpu.memory_space<vmem>>, vector<1x1x8x8xbf16>,
    %42 = arith.truncf %37 : vector<8x8xf32> to vector<8x8xbf16>
    %c0_36 = arith.constant 0 : index
    %c0_37 = arith.constant 0 : index
    %c0_38 = arith.constant 0 : index
    %c0_39 = arith.constant 0 : index
    %43 = vector.load %arg16[%c0_36, %c0_37, %c0_38, %c0_39] : memref<1x1x8x8xbf16, #tpu.memory_space<vmem>>, vector<1x1x8x8xbf16>
    %44 = vector.shape_cast %43 : vector<1x1x8x8xbf16> to vector<8x8xbf16>
    %45 = vector.shape_cast %42 : vector<8x8xbf16> to vector<1x1x8x8xbf16>
    tpu.vector_store %arg16[%c0_36, %c0_37, %c0_38, %c0_39], %45 {strides = array<i32>} : memref<1x1x8x8xbf16, #tpu.memory_space<vmem>>, vector<1x1x8x8xbf16>,
    %46 = arith.truncf %24 : vector<8x8xf32> to vector<8x8xbf16>
    %c0_40 = arith.constant 0 : index
    %c0_41 = arith.constant 0 : index
    %c0_42 = arith.constant 0 : index
    %c0_43 = arith.constant 0 : index
    %47 = vector.load %arg17[%c0_40, %c0_41, %c0_42, %c0_43] : memref<1x1x8x8xbf16, #tpu.memory_space<vmem>>, vector<1x1x8x8xbf16>
    %48 = vector.shape_cast %47 : vector<1x1x8x8xbf16> to vector<8x8xbf16>
    %49 = vector.shape_cast %46 : vector<8x8xbf16> to vector<1x1x8x8xbf16>
    tpu.vector_store %arg17[%c0_40, %c0_41, %c0_42, %c0_43], %49 {strides = array<i32>} : memref<1x1x8x8xbf16, #tpu.memory_space<vmem>>, vector<1x1x8x8xbf16>,
    return
  }
  func.func @transform_0(%arg0: i32, %arg1: i32, %arg2: i32) -> (i32, i32, i32) {
    %c0_i32 = arith.constant 0 : i32
    %c0_i32_0 = arith.constant 0 : i32
    return %arg0, %arg1, %c0_i32 : i32, i32, i32
  }
  func.func @transform_1(%arg0: i32, %arg1: i32, %arg2: i32) -> (i32, i32) {
    %c0_i32 = arith.constant 0 : i32
    %c0_i32_0 = arith.constant 0 : i32
    %c0_i32_1 = arith.constant 0 : i32
    return %c0_i32, %c0_i32_0 : i32, i32
  }
  func.func @transform_2(%arg0: i32, %arg1: i32, %arg2: i32) -> (i32, i32) {
    %c0_i32 = arith.constant 0 : i32
    %c0_i32_0 = arith.constant 0 : i32
    %c0_i32_1 = arith.constant 0 : i32
    return %c0_i32, %c0_i32_0 : i32, i32
  }
  func.func @transform_3(%arg0: i32, %arg1: i32, %arg2: i32) -> (i32, i32, i32) {
    %c0_i32 = arith.constant 0 : i32
    %c0_i32_0 = arith.constant 0 : i32
    %c0_i32_1 = arith.constant 0 : i32
    return %arg2, %c0_i32, %c0_i32_0 : i32, i32, i32
  }
  func.func @transform_4(%arg0: i32, %arg1: i32, %arg2: i32) -> (i32, i32, i32) {
    %c0_i32 = arith.constant 0 : i32
    %c0_i32_0 = arith.constant 0 : i32
    %c0_i32_1 = arith.constant 0 : i32
    return %arg2, %c0_i32, %c0_i32_0 : i32, i32, i32
  }
  func.func @transform_5(%arg0: i32, %arg1: i32, %arg2: i32) -> (i32, i32, i32) {
    %c0_i32 = arith.constant 0 : i32
    %c0_i32_0 = arith.constant 0 : i32
    %c0_i32_1 = arith.constant 0 : i32
    return %arg2, %c0_i32, %c0_i32_0 : i32, i32, i32
  }
  func.func @transform_6(%arg0: i32, %arg1: i32, %arg2: i32) -> (i32, i32, i32) {
    %c0_i32 = arith.constant 0 : i32
    %c0_i32_0 = arith.constant 0 : i32
    %c0_i32_1 = arith.constant 0 : i32
    return %arg2, %c0_i32, %c0_i32_0 : i32, i32, i32
  }
  func.func @transform_7(%arg0: i32, %arg1: i32, %arg2: i32) -> (i32, i32, i32) {
    %c0_i32 = arith.constant 0 : i32
    %c0_i32_0 = arith.constant 0 : i32
    %c0_i32_1 = arith.constant 0 : i32
    return %arg2, %c0_i32, %c0_i32_0 : i32, i32, i32
  }
  func.func @transform_8(%arg0: i32, %arg1: i32, %arg2: i32) -> (i32, i32, i32) {
    %c0_i32 = arith.constant 0 : i32
    %c0_i32_0 = arith.constant 0 : i32
    %c0_i32_1 = arith.constant 0 : i32
    return %arg2, %c0_i32, %c0_i32_0 : i32, i32, i32
  }
  func.func @transform_9(%arg0: i32, %arg1: i32, %arg2: i32) -> (i32, i32, i32) {
    %c0_i32 = arith.constant 0 : i32
    %c0_i32_0 = arith.constant 0 : i32
    return %arg0, %arg1, %c0_i32 : i32, i32, i32
  }
  func.func @transform_10(%arg0: i32, %arg1: i32, %arg2: i32) -> (i32, i32, i32) {
    %c0_i32 = arith.constant 0 : i32
    %c0_i32_0 = arith.constant 0 : i32
    return %arg0, %arg1, %c0_i32 : i32, i32, i32
  }
  func.func @transform_11(%arg0: i32, %arg1: i32, %arg2: i32) -> (i32, i32) {
    %c0_i32 = arith.constant 0 : i32
    %c0_i32_0 = arith.constant 0 : i32
    %c0_i32_1 = arith.constant 0 : i32
    return %c0_i32, %c0_i32_0 : i32, i32
  }
  func.func @transform_12(%arg0: i32, %arg1: i32, %arg2: i32) -> (i32, i32, i32, i32) {
    %c0_i32 = arith.constant 0 : i32
    %c0_i32_0 = arith.constant 0 : i32
    return %arg0, %arg2, %arg1, %c0_i32 : i32, i32, i32, i32
  }
  func.func @transform_13(%arg0: i32, %arg1: i32, %arg2: i32) -> (i32, i32, i32, i32) {
    %c0_i32 = arith.constant 0 : i32
    %c0_i32_0 = arith.constant 0 : i32
    return %arg0, %arg2, %arg1, %c0_i32 : i32, i32, i32, i32
  }
  func.func @transform_14(%arg0: i32, %arg1: i32, %arg2: i32) -> (i32, i32, i32, i32) {
    %c0_i32 = arith.constant 0 : i32
    %c0_i32_0 = arith.constant 0 : i32
    return %arg0, %arg2, %arg1, %c0_i32 : i32, i32, i32, i32
  }
}

module attributes {stable_mosaic.version = 11 : i64} {
  func.func @_flash_attn_dense_kernel(%arg0: i32, %arg1: i32, %arg2: i32, %arg3: i32, %arg4: memref<1x1x8x8xbf16, #tpu.memory_space<vmem>>, %arg5: memref<1x1x8x8xbf16, #tpu.memory_space<vmem>>, %arg6: memref<1x1x8x8xbf16, #tpu.memory_space<vmem>>, %arg7: memref<1x8x32xbf16, #tpu.memory_space<vmem>>, %arg8: memref<1x32xf32, #tpu.memory_space<vmem>>, %arg9: memref<1x8x32xf32, #tpu.memory_space<vmem>>, %arg10: memref<8x1xf32, #tpu.memory_space<vmem>>, %arg11: memref<8x1xf32, #tpu.memory_space<vmem>>, %arg12: memref<8x8xf32, #tpu.memory_space<vmem>>, %arg13: memref<8x32xf32, #tpu.memory_space<vmem>>) attributes {dimension_semantics = [#tpu.dimension_semantics<parallel>, #tpu.dimension_semantics<parallel>, #tpu.dimension_semantics<arbitrary>, #tpu.dimension_semantics<arbitrary>], iteration_bounds = array<i64: 2, 1, 4, 1>, scalar_prefetch = 0 : i64, scratch_operands = 4 : i64, tpu.core_type = #tpu.core_type<tc>, window_params = [{transform_indices = @transform_0, window_bounds = array<i64: 1, 1, 8, 8>}, {transform_indices = @transform_1, window_bounds = array<i64: 1, 1, 8, 8>}, {transform_indices = @transform_2, window_bounds = array<i64: 1, 1, 8, 8>}, {transform_indices = @transform_3, window_bounds = array<i64: 1, 8, 32>}, {pipeline_mode = #tpu.pipeline_mode<synchronous>, transform_indices = @transform_4, window_bounds = array<i64: 1, 32>}, {transform_indices = @transform_5, window_bounds = array<i64: 1, 8, 32>}]} {
    %c8_i32 = arith.constant 8 : i32
    %0 = arith.muli %arg1, %c8_i32 : i32
    %c8_i32_0 = arith.constant 8 : i32
    %1 = arith.muli %arg3, %c8_i32_0 : i32
    %c0_i32 = arith.constant 0 : i32
    %2 = arith.cmpi eq, %arg2, %c0_i32 : i32
    %c0_i32_1 = arith.constant 0 : i32
    %3 = arith.cmpi eq, %arg3, %c0_i32_1 : i32
    %4 = arith.andi %2, %3 : i1
    %5 = arith.extui %4 : i1 to i32
    %c0_i32_2 = arith.constant 0 : i32
    %6 = arith.cmpi ne, %5, %c0_i32_2 : i32
    scf.if %6 {
      %cst = arith.constant 0.000000e+00 : f32
      %22 = vector.broadcast %cst : f32 to vector<8x32xf32>
      %c0 = arith.constant 0 : index
      %c0_10 = arith.constant 0 : index
      %23 = vector.load %arg13[%c0, %c0_10] : memref<8x32xf32, #tpu.memory_space<vmem>>, vector<8x32xf32>
      tpu.vector_store %arg13[%c0, %c0_10], %22 {strides = array<i32>} : memref<8x32xf32, #tpu.memory_space<vmem>>, vector<8x32xf32>,
    } else {
    }
    %c0_i32_3 = arith.constant 0 : i32
    %7 = arith.cmpi eq, %arg3, %c0_i32_3 : i32
    %8 = arith.extui %7 : i1 to i32
    %c0_i32_4 = arith.constant 0 : i32
    %9 = arith.cmpi ne, %8, %c0_i32_4 : i32
    scf.if %9 {
      %cst = arith.constant -1.000000e+30 : f32
      %22 = vector.broadcast %cst : f32 to vector<8x1xf32>
      %c0 = arith.constant 0 : index
      %c0_10 = arith.constant 0 : index
      %23 = vector.load %arg10[%c0, %c0_10] : memref<8x1xf32, #tpu.memory_space<vmem>>, vector<8x1xf32>
      tpu.vector_store %arg10[%c0, %c0_10], %22 {strides = array<i32>} : memref<8x1xf32, #tpu.memory_space<vmem>>, vector<8x1xf32>,
      %cst_11 = arith.constant 0.000000e+00 : f32
      %24 = vector.broadcast %cst_11 : f32 to vector<8x1xf32>
      %c0_12 = arith.constant 0 : index
      %c0_13 = arith.constant 0 : index
      %25 = vector.load %arg11[%c0_12, %c0_13] : memref<8x1xf32, #tpu.memory_space<vmem>>, vector<8x1xf32>
      tpu.vector_store %arg11[%c0_12, %c0_13], %24 {strides = array<i32>} : memref<8x1xf32, #tpu.memory_space<vmem>>, vector<8x1xf32>,
      %cst_14 = arith.constant 0.000000e+00 : f32
      %26 = vector.broadcast %cst_14 : f32 to vector<8x8xf32>
      %c0_15 = arith.constant 0 : index
      %c0_16 = arith.constant 0 : index
      %27 = vector.load %arg12[%c0_15, %c0_16] : memref<8x8xf32, #tpu.memory_space<vmem>>, vector<8x8xf32>
      tpu.vector_store %arg12[%c0_15, %c0_16], %26 {strides = array<i32>} : memref<8x8xf32, #tpu.memory_space<vmem>>, vector<8x8xf32>,
    } else {
    }
    %c7_i32 = arith.constant 7 : i32
    %10 = arith.addi %0, %c7_i32 : i32
    %11 = arith.cmpi sle, %1, %10 : i32
    %12 = arith.extui %11 : i1 to i32
    %c0_i32_5 = arith.constant 0 : i32
    %13 = arith.cmpi ne, %12, %c0_i32_5 : i32
    scf.if %13 {
      %c0 = arith.constant 0 : index
      %c0_10 = arith.constant 0 : index
      %c0_11 = arith.constant 0 : index
      %c0_12 = arith.constant 0 : index
      %22 = vector.load %arg4[%c0, %c0_10, %c0_11, %c0_12] : memref<1x1x8x8xbf16, #tpu.memory_space<vmem>>, vector<1x1x8x8xbf16>
      %23 = vector.shape_cast %22 : vector<1x1x8x8xbf16> to vector<8x8xbf16>
      %c0_13 = arith.constant 0 : index
      %c0_14 = arith.constant 0 : index
      %c0_15 = arith.constant 0 : index
      %c0_16 = arith.constant 0 : index
      %24 = vector.load %arg5[%c0_13, %c0_14, %c0_15, %c0_16] : memref<1x1x8x8xbf16, #tpu.memory_space<vmem>>, vector<1x1x8x8xbf16>
      %25 = vector.shape_cast %24 : vector<1x1x8x8xbf16> to vector<8x8xbf16>
      %cst = arith.constant dense<0.000000e+00> : vector<8x8xf32>
      %26 = tpu.matmul %23, %25, %cst {dimension_numbers = #tpu.dot_dimension_numbers<[1], [1], [0], [0], [0, 0, 1, 0], [], []>} : vector<8x8xbf16>, vector<8x8xbf16>, vector<8x8xf32> -> vector<8x8xf32>
      %27 = tpu.iota {dimensions = array<i32: 0>} : vector<8x8xi32>
      %28 = vector.broadcast %0 : i32 to vector<8x8xi32>
      %29 = arith.addi %28, %27 : vector<8x8xi32>
      %30 = tpu.iota {dimensions = array<i32: 1>} : vector<8x8xi32>
      %31 = vector.broadcast %1 : i32 to vector<8x8xi32>
      %32 = arith.addi %31, %30 : vector<8x8xi32>
      %33 = arith.cmpi sgt, %32, %29 : vector<8x8xi32>
      %cst_17 = arith.constant -1.000000e+30 : f32
      %34 = vector.broadcast %cst_17 : f32 to vector<8x8xf32>
      %35 = arith.select %33, %34, %26 : vector<8x8xi1>, vector<8x8xf32>
      %c0_18 = arith.constant 0 : index
      %c0_19 = arith.constant 0 : index
      %36 = vector.load %arg10[%c0_18, %c0_19] : memref<8x1xf32, #tpu.memory_space<vmem>>, vector<8x1xf32>
      %cst_20 = arith.constant dense<0xFF800000> : vector<8xf32>
      %37 = vector.multi_reduction <maximumf>, %35, %cst_20 [1] : vector<8x8xf32> to vector<8xf32>
      %38 = vector.shape_cast %37 : vector<8xf32> to vector<8x1xf32>
      %39 = arith.maximumf %36, %38 : vector<8x1xf32>
      %40 = arith.subf %36, %39 : vector<8x1xf32>
      %41 = math.exp %40 : vector<8x1xf32>
      %42 = vector.broadcast %39 : vector<8x1xf32> to vector<8x8xf32>
      %43 = arith.subf %35, %42 : vector<8x8xf32>
      %44 = math.exp %43 : vector<8x8xf32>
      %c0_21 = arith.constant 0 : index
      %c0_22 = arith.constant 0 : index
      %45 = vector.load %arg11[%c0_21, %c0_22] : memref<8x1xf32, #tpu.memory_space<vmem>>, vector<8x1xf32>
      %46 = arith.mulf %41, %45 : vector<8x1xf32>
      %cst_23 = arith.constant dense<0.000000e+00> : vector<8xf32>
      %47 = vector.multi_reduction <add>, %44, %cst_23 [1] : vector<8x8xf32> to vector<8xf32>
      %48 = vector.shape_cast %47 : vector<8xf32> to vector<8x1xf32>
      %49 = arith.addf %46, %48 : vector<8x1xf32>
      %c0_24 = arith.constant 0 : index
      %c0_25 = arith.constant 0 : index
      %50 = vector.load %arg11[%c0_24, %c0_25] : memref<8x1xf32, #tpu.memory_space<vmem>>, vector<8x1xf32>
      tpu.vector_store %arg11[%c0_24, %c0_25], %49 {strides = array<i32>} : memref<8x1xf32, #tpu.memory_space<vmem>>, vector<8x1xf32>,
      %c0_26 = arith.constant 0 : index
      %c0_27 = arith.constant 0 : index
      %51 = vector.load %arg12[%c0_26, %c0_27] : memref<8x8xf32, #tpu.memory_space<vmem>>, vector<8x8xf32>
      %52 = vector.broadcast %41 : vector<8x1xf32> to vector<8x8xf32>
      %53 = arith.mulf %52, %51 : vector<8x8xf32>
      %54 = arith.truncf %44 : vector<8x8xf32> to vector<8x8xbf16>
      %c0_28 = arith.constant 0 : index
      %c0_29 = arith.constant 0 : index
      %c0_30 = arith.constant 0 : index
      %c0_31 = arith.constant 0 : index
      %55 = vector.load %arg6[%c0_28, %c0_29, %c0_30, %c0_31] : memref<1x1x8x8xbf16, #tpu.memory_space<vmem>>, vector<1x1x8x8xbf16>
      %56 = vector.shape_cast %55 : vector<1x1x8x8xbf16> to vector<8x8xbf16>
      %cst_32 = arith.constant dense<0.000000e+00> : vector<8x8xf32>
      %57 = tpu.matmul %54, %56, %cst_32 {dimension_numbers = #tpu.dot_dimension_numbers<[1], [0], [0], [1], [0, 0, 1, 1], [], []>} : vector<8x8xbf16>, vector<8x8xbf16>, vector<8x8xf32> -> vector<8x8xf32>
      %58 = arith.addf %53, %57 : vector<8x8xf32>
      %c0_33 = arith.constant 0 : index
      %c0_34 = arith.constant 0 : index
      %59 = vector.load %arg12[%c0_33, %c0_34] : memref<8x8xf32, #tpu.memory_space<vmem>>, vector<8x8xf32>
      tpu.vector_store %arg12[%c0_33, %c0_34], %58 {strides = array<i32>} : memref<8x8xf32, #tpu.memory_space<vmem>>, vector<8x8xf32>,
      %c0_35 = arith.constant 0 : index
      %c0_36 = arith.constant 0 : index
      %60 = vector.load %arg10[%c0_35, %c0_36] : memref<8x1xf32, #tpu.memory_space<vmem>>, vector<8x1xf32>
      tpu.vector_store %arg10[%c0_35, %c0_36], %39 {strides = array<i32>} : memref<8x1xf32, #tpu.memory_space<vmem>>, vector<8x1xf32>,
    } else {
    }
    %c0_i32_6 = arith.constant 0 : i32
    %14 = arith.cmpi eq, %arg3, %c0_i32_6 : i32
    %15 = arith.extui %14 : i1 to i32
    %c0_i32_7 = arith.constant 0 : i32
    %16 = arith.cmpi ne, %15, %c0_i32_7 : i32
    scf.if %16 {
      %c0 = arith.constant 0 : index
      %c0_10 = arith.constant 0 : index
      %22 = vector.load %arg12[%c0, %c0_10] : memref<8x8xf32, #tpu.memory_space<vmem>>, vector<8x8xf32>
      %c0_11 = arith.constant 0 : index
      %c0_12 = arith.constant 0 : index
      %23 = vector.load %arg11[%c0_11, %c0_12] : memref<8x1xf32, #tpu.memory_space<vmem>>, vector<8x1xf32>
      %24 = tpu.reciprocal %23 {approx = true} : vector<8x1xf32> -> vector<8x1xf32>
      %25 = vector.broadcast %24 : vector<8x1xf32> to vector<8x8xf32>
      %26 = arith.mulf %22, %25 : vector<8x8xf32>
      %c0_13 = arith.constant 0 : index
      %c0_14 = arith.constant 0 : index
      %27 = vector.load %arg13[%c0_13, %c0_14] : memref<8x32xf32, #tpu.memory_space<vmem>>, vector<8x32xf32>
      %28 = arith.truncf %26 : vector<8x8xf32> to vector<8x8xbf16>
      %c0_15 = arith.constant 0 : index
      %c0_16 = arith.constant 0 : index
      %c0_17 = arith.constant 0 : index
      %29 = vector.load %arg7[%c0_15, %c0_16, %c0_17] : memref<1x8x32xbf16, #tpu.memory_space<vmem>>, vector<1x8x32xbf16>
      %30 = vector.shape_cast %29 : vector<1x8x32xbf16> to vector<8x32xbf16>
      %cst = arith.constant dense<0.000000e+00> : vector<8x32xf32>
      %31 = tpu.matmul %28, %30, %cst {dimension_numbers = #tpu.dot_dimension_numbers<[1], [0], [0], [1], [0, 0, 1, 1], [], []>} : vector<8x8xbf16>, vector<8x32xbf16>, vector<8x32xf32> -> vector<8x32xf32>
      %32 = arith.addf %27, %31 : vector<8x32xf32>
      %c0_18 = arith.constant 0 : index
      %c0_19 = arith.constant 0 : index
      %33 = vector.load %arg13[%c0_18, %c0_19] : memref<8x32xf32, #tpu.memory_space<vmem>>, vector<8x32xf32>
      tpu.vector_store %arg13[%c0_18, %c0_19], %32 {strides = array<i32>} : memref<8x32xf32, #tpu.memory_space<vmem>>, vector<8x32xf32>,
    } else {
    }
    %c0_i32_8 = arith.constant 0 : i32
    %17 = arith.cmpi eq, %arg3, %c0_i32_8 : i32
    %c3_i32 = arith.constant 3 : i32
    %18 = arith.cmpi eq, %arg2, %c3_i32 : i32
    %19 = arith.andi %17, %18 : i1
    %20 = arith.extui %19 : i1 to i32
    %c0_i32_9 = arith.constant 0 : i32
    %21 = arith.cmpi ne, %20, %c0_i32_9 : i32
    scf.if %21 {
      %c0 = arith.constant 0 : index
      %c0_10 = arith.constant 0 : index
      %22 = vector.load %arg13[%c0, %c0_10] : memref<8x32xf32, #tpu.memory_space<vmem>>, vector<8x32xf32>
      %c0_11 = arith.constant 0 : index
      %c0_12 = arith.constant 0 : index
      %23 = vector.load %arg8[%c0_11, %c0_12] : memref<1x32xf32, #tpu.memory_space<vmem>>, vector<1x32xf32>
      %24 = vector.broadcast %23 : vector<1x32xf32> to vector<8x32xf32>
      %25 = arith.addf %22, %24 : vector<8x32xf32>
      %c0_13 = arith.constant 0 : index
      %c0_14 = arith.constant 0 : index
      %c0_15 = arith.constant 0 : index
      %26 = vector.load %arg9[%c0_13, %c0_14, %c0_15] : memref<1x8x32xf32, #tpu.memory_space<vmem>>, vector<1x8x32xf32>
      %27 = vector.shape_cast %26 : vector<1x8x32xf32> to vector<8x32xf32>
      %28 = vector.shape_cast %25 : vector<8x32xf32> to vector<1x8x32xf32>
      tpu.vector_store %arg9[%c0_13, %c0_14, %c0_15], %28 {strides = array<i32>} : memref<1x8x32xf32, #tpu.memory_space<vmem>>, vector<1x8x32xf32>,
    } else {
    }
    return
  }
  func.func @transform_0(%arg0: i32, %arg1: i32, %arg2: i32, %arg3: i32) -> (i32, i32, i32, i32) {
    %c0_i32 = arith.constant 0 : i32
    %c0_i32_0 = arith.constant 0 : i32
    return %arg0, %arg2, %arg1, %c0_i32 : i32, i32, i32, i32
  }
  func.func @transform_1(%arg0: i32, %arg1: i32, %arg2: i32, %arg3: i32) -> (i32, i32, i32, i32) {
    %c0_i32 = arith.constant 0 : i32
    %c0_i32_0 = arith.constant 0 : i32
    return %arg0, %arg2, %arg3, %c0_i32 : i32, i32, i32, i32
  }
  func.func @transform_2(%arg0: i32, %arg1: i32, %arg2: i32, %arg3: i32) -> (i32, i32, i32, i32) {
    %c0_i32 = arith.constant 0 : i32
    %c0_i32_0 = arith.constant 0 : i32
    return %arg0, %arg2, %arg3, %c0_i32 : i32, i32, i32, i32
  }
  func.func @transform_3(%arg0: i32, %arg1: i32, %arg2: i32, %arg3: i32) -> (i32, i32, i32) {
    %c0_i32 = arith.constant 0 : i32
    %c0_i32_0 = arith.constant 0 : i32
    %c0_i32_1 = arith.constant 0 : i32
    return %arg2, %c0_i32, %c0_i32_0 : i32, i32, i32
  }
  func.func @transform_4(%arg0: i32, %arg1: i32, %arg2: i32, %arg3: i32) -> (i32, i32) {
    %c0_i32 = arith.constant 0 : i32
    %c0_i32_0 = arith.constant 0 : i32
    %c0_i32_1 = arith.constant 0 : i32
    return %c0_i32, %c0_i32_0 : i32, i32
  }
  func.func @transform_5(%arg0: i32, %arg1: i32, %arg2: i32, %arg3: i32) -> (i32, i32, i32) {
    %c0_i32 = arith.constant 0 : i32
    %c0_i32_0 = arith.constant 0 : i32
    return %arg0, %arg1, %c0_i32 : i32, i32, i32
  }
}

module attributes {stable_mosaic.version = 11 : i64} {
  func.func @_ln_mlp_residual_kernel(%arg0: i32, %arg1: i32, %arg2: memref<8x32xf32, #tpu.memory_space<vmem>>, %arg3: memref<1x32xf32, #tpu.memory_space<vmem>>, %arg4: memref<1x32xf32, #tpu.memory_space<vmem>>, %arg5: memref<8x32xf32, #tpu.memory_space<vmem>>, %arg6: memref<32x128xbf16, #tpu.memory_space<vmem>>, %arg7: memref<1x128xf32, #tpu.memory_space<vmem>>, %arg8: memref<128x32xbf16, #tpu.memory_space<vmem>>, %arg9: memref<1x32xf32, #tpu.memory_space<vmem>>, %arg10: memref<8x32xf32, #tpu.memory_space<vmem>>, %arg11: memref<8x32xbf16, #tpu.memory_space<vmem>>, %arg12: memref<8x32xf32, #tpu.memory_space<vmem>>) attributes {dimension_semantics = [#tpu.dimension_semantics<parallel>, #tpu.dimension_semantics<arbitrary>], iteration_bounds = array<i64: 2, 1>, scalar_prefetch = 0 : i64, scratch_operands = 2 : i64, tpu.core_type = #tpu.core_type<tc>, window_params = [{transform_indices = @transform_0, window_bounds = array<i64: 8, 32>}, {pipeline_mode = #tpu.pipeline_mode<synchronous>, transform_indices = @transform_1, window_bounds = array<i64: 1, 32>}, {pipeline_mode = #tpu.pipeline_mode<synchronous>, transform_indices = @transform_2, window_bounds = array<i64: 1, 32>}, {transform_indices = @transform_3, window_bounds = array<i64: 8, 32>}, {transform_indices = @transform_4, window_bounds = array<i64: 32, 128>}, {transform_indices = @transform_5, window_bounds = array<i64: 1, 128>}, {transform_indices = @transform_6, window_bounds = array<i64: 128, 32>}, {pipeline_mode = #tpu.pipeline_mode<synchronous>, transform_indices = @transform_7, window_bounds = array<i64: 1, 32>}, {transform_indices = @transform_8, window_bounds = array<i64: 8, 32>}]} {
    %c0_i32 = arith.constant 0 : i32
    %0 = arith.cmpi eq, %arg1, %c0_i32 : i32
    %1 = arith.extui %0 : i1 to i32
    %c0_i32_0 = arith.constant 0 : i32
    %2 = arith.cmpi ne, %1, %c0_i32_0 : i32
    scf.if %2 {
      %cst_19 = arith.constant 0.000000e+00 : f32
      %31 = vector.broadcast %cst_19 : f32 to vector<8x32xf32>
      %c0_20 = arith.constant 0 : index
      %c0_21 = arith.constant 0 : index
      %32 = vector.load %arg12[%c0_20, %c0_21] : memref<8x32xf32, #tpu.memory_space<vmem>>, vector<8x32xf32>
      tpu.vector_store %arg12[%c0_20, %c0_21], %31 {strides = array<i32>} : memref<8x32xf32, #tpu.memory_space<vmem>>, vector<8x32xf32>,
      %c0_22 = arith.constant 0 : index
      %c0_23 = arith.constant 0 : index
      %33 = vector.load %arg2[%c0_22, %c0_23] : memref<8x32xf32, #tpu.memory_space<vmem>>, vector<8x32xf32>
      %cst_24 = arith.constant dense<0.000000e+00> : vector<8xf32>
      %34 = vector.multi_reduction <add>, %33, %cst_24 [1] : vector<8x32xf32> to vector<8xf32>
      %35 = vector.shape_cast %34 : vector<8xf32> to vector<8x1xf32>
      %cst_25 = arith.constant 3.200000e+01 : f32
      %36 = vector.broadcast %cst_25 : f32 to vector<8x1xf32>
      %37 = arith.divf %35, %36 : vector<8x1xf32>
      %38 = vector.broadcast %37 : vector<8x1xf32> to vector<8x32xf32>
      %39 = arith.subf %33, %38 : vector<8x32xf32>
      %40 = arith.mulf %39, %39 : vector<8x32xf32>
      %cst_26 = arith.constant dense<0.000000e+00> : vector<8xf32>
      %41 = vector.multi_reduction <add>, %40, %cst_26 [1] : vector<8x32xf32> to vector<8xf32>
      %42 = vector.shape_cast %41 : vector<8xf32> to vector<8x1xf32>
      %cst_27 = arith.constant 3.200000e+01 : f32
      %43 = vector.broadcast %cst_27 : f32 to vector<8x1xf32>
      %44 = arith.divf %42, %43 : vector<8x1xf32>
      %45 = vector.broadcast %37 : vector<8x1xf32> to vector<8x32xf32>
      %46 = arith.subf %33, %45 : vector<8x32xf32>
      %cst_28 = arith.constant 9.99999974E-6 : f32
      %47 = vector.broadcast %cst_28 : f32 to vector<8x1xf32>
      %48 = arith.addf %44, %47 : vector<8x1xf32>
      %49 = math.rsqrt %48 : vector<8x1xf32>
      %50 = vector.broadcast %49 : vector<8x1xf32> to vector<8x32xf32>
      %51 = arith.mulf %46, %50 : vector<8x32xf32>
      %c0_29 = arith.constant 0 : index
      %c0_30 = arith.constant 0 : index
      %52 = vector.load %arg3[%c0_29, %c0_30] : memref<1x32xf32, #tpu.memory_space<vmem>>, vector<1x32xf32>
      %53 = vector.broadcast %52 : vector<1x32xf32> to vector<8x32xf32>
      %54 = arith.mulf %51, %53 : vector<8x32xf32>
      %c0_31 = arith.constant 0 : index
      %c0_32 = arith.constant 0 : index
      %55 = vector.load %arg4[%c0_31, %c0_32] : memref<1x32xf32, #tpu.memory_space<vmem>>, vector<1x32xf32>
      %56 = vector.broadcast %55 : vector<1x32xf32> to vector<8x32xf32>
      %57 = arith.addf %54, %56 : vector<8x32xf32>
      %58 = arith.truncf %57 : vector<8x32xf32> to vector<8x32xbf16>
      %c0_33 = arith.constant 0 : index
      %c0_34 = arith.constant 0 : index
      %59 = vector.load %arg11[%c0_33, %c0_34] : memref<8x32xbf16, #tpu.memory_space<vmem>>, vector<8x32xbf16>
      tpu.vector_store %arg11[%c0_33, %c0_34], %58 {strides = array<i32>} : memref<8x32xbf16, #tpu.memory_space<vmem>>, vector<8x32xbf16>,
    } else {
    }
    %c0 = arith.constant 0 : index
    %c0_1 = arith.constant 0 : index
    %3 = vector.load %arg11[%c0, %c0_1] : memref<8x32xbf16, #tpu.memory_space<vmem>>, vector<8x32xbf16>
    %c0_2 = arith.constant 0 : index
    %c0_3 = arith.constant 0 : index
    %4 = vector.load %arg6[%c0_2, %c0_3] : memref<32x128xbf16, #tpu.memory_space<vmem>>, vector<32x128xbf16>
    %cst = arith.constant dense<0.000000e+00> : vector<8x128xf32>
    %5 = tpu.matmul %3, %4, %cst {dimension_numbers = #tpu.dot_dimension_numbers<[1], [0], [0], [1], [0, 0, 1, 1], [], []>} : vector<8x32xbf16>, vector<32x128xbf16>, vector<8x128xf32> -> vector<8x128xf32>
    %c0_4 = arith.constant 0 : index
    %c0_5 = arith.constant 0 : index
    %6 = vector.load %arg7[%c0_4, %c0_5] : memref<1x128xf32, #tpu.memory_space<vmem>>, vector<1x128xf32>
    %7 = vector.broadcast %6 : vector<1x128xf32> to vector<8x128xf32>
    %8 = arith.addf %5, %7 : vector<8x128xf32>
    %cst_6 = arith.constant 5.000000e-01 : f32
    %9 = vector.broadcast %cst_6 : f32 to vector<8x128xf32>
    %10 = arith.mulf %9, %8 : vector<8x128xf32>
    %cst_7 = arith.constant 4.471500e-02 : f32
    %11 = vector.broadcast %cst_7 : f32 to vector<8x128xf32>
    %12 = arith.mulf %11, %8 : vector<8x128xf32>
    %13 = arith.mulf %12, %8 : vector<8x128xf32>
    %14 = arith.mulf %13, %8 : vector<8x128xf32>
    %15 = arith.addf %8, %14 : vector<8x128xf32>
    %cst_8 = arith.constant 0.797884583 : f32
    %16 = vector.broadcast %cst_8 : f32 to vector<8x128xf32>
    %17 = arith.mulf %16, %15 : vector<8x128xf32>
    %18 = math.tanh %17 : vector<8x128xf32>
    %cst_9 = arith.constant 1.000000e+00 : f32
    %19 = vector.broadcast %cst_9 : f32 to vector<8x128xf32>
    %20 = arith.addf %19, %18 : vector<8x128xf32>
    %21 = arith.mulf %10, %20 : vector<8x128xf32>
    %c0_10 = arith.constant 0 : index
    %c0_11 = arith.constant 0 : index
    %22 = vector.load %arg12[%c0_10, %c0_11] : memref<8x32xf32, #tpu.memory_space<vmem>>, vector<8x32xf32>
    %23 = arith.truncf %21 : vector<8x128xf32> to vector<8x128xbf16>
    %c0_12 = arith.constant 0 : index
    %c0_13 = arith.constant 0 : index
    %24 = vector.load %arg8[%c0_12, %c0_13] : memref<128x32xbf16, #tpu.memory_space<vmem>>, vector<128x32xbf16>
    %cst_14 = arith.constant dense<0.000000e+00> : vector<8x32xf32>
    %25 = tpu.matmul %23, %24, %cst_14 {dimension_numbers = #tpu.dot_dimension_numbers<[1], [0], [0], [1], [0, 0, 1, 1], [], []>} : vector<8x128xbf16>, vector<128x32xbf16>, vector<8x32xf32> -> vector<8x32xf32>
    %26 = arith.addf %22, %25 : vector<8x32xf32>
    %c0_15 = arith.constant 0 : index
    %c0_16 = arith.constant 0 : index
    %27 = vector.load %arg12[%c0_15, %c0_16] : memref<8x32xf32, #tpu.memory_space<vmem>>, vector<8x32xf32>
    tpu.vector_store %arg12[%c0_15, %c0_16], %26 {strides = array<i32>} : memref<8x32xf32, #tpu.memory_space<vmem>>, vector<8x32xf32>,
    %c0_i32_17 = arith.constant 0 : i32
    %28 = arith.cmpi eq, %arg1, %c0_i32_17 : i32
    %29 = arith.extui %28 : i1 to i32
    %c0_i32_18 = arith.constant 0 : i32
    %30 = arith.cmpi ne, %29, %c0_i32_18 : i32
    scf.if %30 {
      %c0_19 = arith.constant 0 : index
      %c0_20 = arith.constant 0 : index
      %31 = vector.load %arg12[%c0_19, %c0_20] : memref<8x32xf32, #tpu.memory_space<vmem>>, vector<8x32xf32>
      %c0_21 = arith.constant 0 : index
      %c0_22 = arith.constant 0 : index
      %32 = vector.load %arg9[%c0_21, %c0_22] : memref<1x32xf32, #tpu.memory_space<vmem>>, vector<1x32xf32>
      %33 = vector.broadcast %32 : vector<1x32xf32> to vector<8x32xf32>
      %34 = arith.addf %31, %33 : vector<8x32xf32>
      %c0_23 = arith.constant 0 : index
      %c0_24 = arith.constant 0 : index
      %35 = vector.load %arg2[%c0_23, %c0_24] : memref<8x32xf32, #tpu.memory_space<vmem>>, vector<8x32xf32>
      %36 = arith.addf %34, %35 : vector<8x32xf32>
      %c0_25 = arith.constant 0 : index
      %c0_26 = arith.constant 0 : index
      %37 = vector.load %arg5[%c0_25, %c0_26] : memref<8x32xf32, #tpu.memory_space<vmem>>, vector<8x32xf32>
      %38 = arith.addf %36, %37 : vector<8x32xf32>
      %c0_27 = arith.constant 0 : index
      %c0_28 = arith.constant 0 : index
      %39 = vector.load %arg10[%c0_27, %c0_28] : memref<8x32xf32, #tpu.memory_space<vmem>>, vector<8x32xf32>
      tpu.vector_store %arg10[%c0_27, %c0_28], %38 {strides = array<i32>} : memref<8x32xf32, #tpu.memory_space<vmem>>, vector<8x32xf32>,
    } else {
    }
    return
  }
  func.func @transform_0(%arg0: i32, %arg1: i32) -> (i32, i32) {
    %c0_i32 = arith.constant 0 : i32
    %c0_i32_0 = arith.constant 0 : i32
    return %arg0, %c0_i32 : i32, i32
  }
  func.func @transform_1(%arg0: i32, %arg1: i32) -> (i32, i32) {
    %c0_i32 = arith.constant 0 : i32
    %c0_i32_0 = arith.constant 0 : i32
    %c0_i32_1 = arith.constant 0 : i32
    return %c0_i32, %c0_i32_0 : i32, i32
  }
  func.func @transform_2(%arg0: i32, %arg1: i32) -> (i32, i32) {
    %c0_i32 = arith.constant 0 : i32
    %c0_i32_0 = arith.constant 0 : i32
    %c0_i32_1 = arith.constant 0 : i32
    return %c0_i32, %c0_i32_0 : i32, i32
  }
  func.func @transform_3(%arg0: i32, %arg1: i32) -> (i32, i32) {
    %c0_i32 = arith.constant 0 : i32
    %c0_i32_0 = arith.constant 0 : i32
    return %arg0, %c0_i32 : i32, i32
  }
  func.func @transform_4(%arg0: i32, %arg1: i32) -> (i32, i32) {
    %c0_i32 = arith.constant 0 : i32
    %c0_i32_0 = arith.constant 0 : i32
    return %c0_i32, %arg1 : i32, i32
  }
  func.func @transform_5(%arg0: i32, %arg1: i32) -> (i32, i32) {
    %c0_i32 = arith.constant 0 : i32
    %c0_i32_0 = arith.constant 0 : i32
    return %c0_i32, %arg1 : i32, i32
  }
  func.func @transform_6(%arg0: i32, %arg1: i32) -> (i32, i32) {
    %c0_i32 = arith.constant 0 : i32
    %c0_i32_0 = arith.constant 0 : i32
    return %arg1, %c0_i32 : i32, i32
  }
  func.func @transform_7(%arg0: i32, %arg1: i32) -> (i32, i32) {
    %c0_i32 = arith.constant 0 : i32
    %c0_i32_0 = arith.constant 0 : i32
    %c0_i32_1 = arith.constant 0 : i32
    return %c0_i32, %c0_i32_0 : i32, i32
  }
  func.func @transform_8(%arg0: i32, %arg1: i32) -> (i32, i32) {
    %c0_i32 = arith.constant 0 : i32
    %c0_i32_0 = arith.constant 0 : i32
    return %arg0, %c0_i32 : i32, i32
  }
}

</mosaic_0001>

<bundles_post_ra>
// kernel: gpt_neox_layer_pallas.5
= control target key start
LH: loop header
LB: loop body
LE: loop exit
PB: predicated region body
PF: predicated region fallthrough
CT: control target
= control target key end

     0   :  { %s1190_s0 = inlined_call_operand.vmem [shape: f32[16,32], index: 0, kind: input, shape index: {}]   ;;  %s1191_s1 = inlined_call_operand.vmem [shape: f32[1,32], index: 1, kind: input, shape index: {}]   ;;  %s1192_s2 = inlined_call_operand.vmem [shape: f32[1,32], index: 2, kind: input, shape index: {}]   ;;  %s1193_s3 = inlined_call_operand.vmem [shape: f32[16,32], index: 3, kind: input, shape index: {}]   ;;  %s1194_s4 = inlined_call_operand.vmem [shape: bf16[32,128], index: 4, kind: input, shape index: {}]   ;;  %s1195_s5 = inlined_call_operand.vmem [shape: f32[1,128], index: 5, kind: input, shape index: {}]   ;;  %s1196_s6 = inlined_call_operand.vmem [shape: bf16[128,32], index: 6, kind: input, shape index: {}]   ;;  %s1197_s7 = inlined_call_operand.vmem [shape: f32[1,32], index: 7, kind: input, shape index: {}]   ;;  %s1198_s8 = inlined_call_operand.hbm [shape: f32[16,32], index: 8, kind: output, shape index: {}]  }
   0x1   :  { %1199 = sst [smem:[#allocation7_spill]] %s1190_s0 }
   0x2   :  { %1200 = sst [smem:[#allocation8_spill]] %s1191_s1 }
   0x3   :  { %13 = vsyncpa [#allocation5], 0 }
   0x4   :  { %15 = vsyncpa [#allocation5 + $0x1], 0  ;;  %s1028_s27 = smov 0   ;;  %s1030_s28 = smov 0  }
   0x5   :  { %s1032_s29 = smov 0   ;;  %s1034_s30 = smov 0  }
   0x6   :  { %s1036_s9 = smov 0   ;;  %s1038_s10 = smov 0  }
   0x7 LB: > { %s761_s11 = sadd.s32 4294967295, %s978_s10   ;;  %s762_s12 = sadd.s32 4294967294, %s978_s10   ;;  %s978_s10 = sphi %s1038_s10, %s21_s10   ;;  %s974_s9 = sphi %s1036_s9, %s1209_s9   ;;  %s970_s30 = sphi %s1034_s30, %s1208_s30   ;;  %s966_s29 = sphi %s1032_s29, %s1207_s29   ;;  %s962_s28 = sphi %s1030_s28, %s1206_s28   ;;  %s958_s27 = sphi %s1028_s27, %s1205_s27  }
   0x8   : > { %s33_s13 = sadd.s32 1, %s974_s9  ;;  %s233_s14 = sadd.s32 1, %s966_s29 }
   0x9   : > { %p35_p0 = scmp.ge.s32.totalorder %s33_s13, 2  ;;  %p243_p1 = scmp.ne.s32.totalorder %s966_s29, %s962_s28 }
   0xa   : > { %p244_p2 = scmp.eq.s32.totalorder %s761_s11, 1  ;;  %p249_p3 = scmp.ne.s32.totalorder %s962_s28, %s958_s27 }
   0xb   : > { %s1211_s13 = smov (%p35_p0, %s33_s13), 0  ;;  %p250_p5 = scmp.eq.s32.totalorder %s762_s12, 1 }
   0xc   : > { %p1068_p4 = por %p244_p2, %p243_p1  ;;  %s230_s16 = ssub.s32 %s974_s9, %s1211_s13 }
   0xd   : > { %p768_p6 = scmp.ge.s32.totalorder %s978_s10, 1  ;;  %p231_p7 = scmp.eq.s32.totalorder %s230_s16, 0 }
   0xe   : > { %p1075_p8 = por %p250_p5, %p249_p3  ;;  %p313_p9 = scmp.lt.s32.totalorder %s978_s10, 3 }
   0xf   : > { %s1081_s18 = scalar_select %p231_p7, %s966_s29, %s233_s14  }
  0x10   : > { %p314_p10 = pnand %p768_p6, %p313_p9 }
  0x11   : > { %p362_p11 = scmp.lt.s32.totalorder (!%p314_p10), %s970_s30, 1  ;;  %s1203_s0 = sld [smem:[#allocation7_spill]] (!%p314_p10) }
  0x12   : > { %317 = sbr.rel (%p314_p10) target bundleno = 793 (0x319), region = 52  ;;  %s1204_s1 = sld [smem:[#allocation8_spill]] (!%p314_p10) }
  0x13   : > { %s359_s16 = sand.u32 (!%p314_p10), 1, %s962_s28   ;;  %s788_s11 = sshll.u32 (!%p314_p10), %s970_s30, 7 }
  0x14   : > { %s769_s21 = sshll.u32 (!%p314_p10), %s359_s16, 3  ;;  %s638_s22 = scalar_lea.hbm (!%p314_p10), %s1198_s8, %s788_s11 }
  0x15   : > { %s361_s12 = scalar_lea.vmem (!%p314_p10), [#allocation4], %s769_s21 }
  0x16   : > { %s640_s14 = sshll.u32 (!%p314_p10), %s361_s12, 4  ;;  %s641_s14 = int_to_ptr.vmem [resolvable:$true] %s640_s14 }
  0x17   : > { %s1085_s19 = scalar_select %p362_p11, %s970_s30, 1  ;;  %vm388_vm0 = vcmask 261120   ;;  %v888_v7 = vld [vmem:[%s1194_s4 + $0x8] sm:$0xff]   ;;  %v980_v8 = vmov 0.0   ;;  %v889_v9 = vld [vmem:[%s1194_s4] sm:$0xff]   ;;  %vm981_vm1 = vmmov 0  }
  0x18   : > { %803 = vmatprep.subr.bf16.mxu0 %v980_v8  ;;  %389 = vst.msk [vmem:[#allocation3] sm:$0xff] %vm388_vm0, %v980_v8  ;;  %811 = vmatprep.subr.bf16.mxu1 %v980_v8  ;;  %v772_v14 = vld [vmem:[%s1204_s1] ss:$0 sm:$0xff]  ;;  %vm422_vm2 = vcmask 257024   ;;  %v890_v21 = vld [vmem:[%s1196_s6 + $0x38] sm:$0xff]   ;;  %v891_v22 = vld [vmem:[%s1196_s6 + $0x30] sm:$0xff]  }
  0x19   : > { %s770_s20 = sshll.u32 %s1085_s19, 3  ;;  %804 = vmatpush3.bf16.msra.mxu0 %v888_v7  ;;  %807 = vmatprep.mubr.msk.bf16.mxu0 %vm981_vm1, %v980_v8  ;;  %v773_v16 = vld [vmem:[%s1192_s2] ss:$0 sm:$0xff]  ;;  %v892_v23 = vld [vmem:[%s1196_s6 + $0x28] sm:$0xff]   ;;  %v894_v25 = vld [vmem:[%s1196_s6 + $0x18] sm:$0xff]   ;;  %s627_s19 = scalar_lea.sflag [#allocation5], %s359_s16 }
  0x1a   : > { %s365_s23 = scalar_lea.vmem %s1203_s0, %s770_s20  ;;  %805 = vmatprep.subr.bf16.mxu0 %v980_v8  ;;  %827 = vmatprep.mubr.msk.bf16.mxu1 %vm981_vm1, %v980_v8  ;;  %v893_v24 = vld [vmem:[%s1196_s6 + $0x20] sm:$0xff]   ;;  %v895_v26 = vld [vmem:[%s1196_s6 + $0x10] sm:$0xff]   ;;  %v896_v27 = vld [vmem:[%s1196_s6 + $0x8] sm:$0xff]   ;;  %s369_s26 = scalar_lea.vmem %s1193_s3, %s770_s20 }
  0x1b   : > { %v1093_v0 = vld [vmem:[%s365_s23] sm:$0xff]  ;;  %812 = vmatpush3.bf16.msra.mxu1 %v890_v21  ;;  %s902_s23 = scalar_lea.vmem %s641_s14, 128  ;;  %s982_s20 = smov [#allocation4]  }
  0x1c   : > { %v391_v1 = vsel %vm388_vm0, %v1093_v0, 0.0  ;;  %813 = vmatprep.subr.bf16.mxu1 %v980_v8  ;;  %v897_v28 = vld [vmem:[%s1196_s6] sm:$0xff]   ;;  %p903_p12 = scmp.ne.s32.totalorder %s641_s14, %s902_s23  ;;  %s906_s30 = sshll.u32 %s982_s20, 4  ;;  %s907_s30 = int_to_ptr.vmem [resolvable:$false] %s906_s30 }
  0x1d   : > { %392 = vadd.xlane.f32.xlu0 %v391_v1  ;;  %806 = vmatpush3.bf16.msra.mxu0 %v889_v9  ;;  %v774_v29 = vld [vmem:[%s1195_s5] ss:$0 sm:$0xff]  ;;  %s908_s21 = scalar_lea.vmem %s907_s30, 256  ;;  %p909_p1 = scmp.lt.s32.totalorder %s641_s14, %s907_s30 }
  0x1e   : > { %v786_v51 = vld [vmem:[%s1197_s7] ss:$0 sm:$0xff]  ;;  %p904_p13 = pnand %p903_p12, %p1068_p4  ;;  %p910_p2 = scmp.lt.s32.totalorder %s908_s21, %s902_s23 }
  0x1f   : > { %814 = vmatpush3.bf16.msra.mxu1 %v891_v22  ;;  %v501_v45 = vld [vmem:[#allocation3] sm:$0xff] }
  0x20   : > { %815 = vmatprep.subr.bf16.mxu1 %v980_v8  ;;  %v623_v54 = vld [vmem:[%s369_s26] sm:$0xff]  ;;  %p905_p0 = pneg %p904_p13  ;;  %p911_p3 = por %p910_p2, %p909_p1 }
  0x22   : > { %p912_p5 = pnand %p911_p3, %p905_p0 }
  0x23   : > { %816 = vmatpush3.bf16.msra.mxu1 %v892_v23 }
  0x24   : > { %817 = vmatprep.subr.bf16.mxu1 %v980_v8 }
  0x27   : > { %818 = vmatpush3.bf16.msra.mxu1 %v893_v24 }
  0x28   : > { %819 = vmatprep.subr.bf16.mxu1 %v980_v8 }
  0x2b   : > { %820 = vmatpush3.bf16.msra.mxu1 %v894_v25 }
  0x2c   : > { %821 = vmatprep.subr.bf16.mxu1 %v980_v8 }
  0x2f   : > { %822 = vmatpush3.bf16.msra.mxu1 %v895_v26 }
  0x30   : > { %823 = vmatprep.subr.bf16.mxu1 %v980_v8 }
  0x33   : > { %824 = vmatpush3.bf16.msra.mxu1 %v896_v27 }
  0x34   : > { %825 = vmatprep.subr.bf16.mxu1 %v980_v8 }
  0x37   : > { %826 = vmatpush3.bf16.msra.mxu1 %v897_v28 }
  0xa6   : > { %v393_v2 = vpop.xlane.xlu0 %392 }
  0xa7   : > { %v395_v3 = vmul.f32 0.03125, %v393_v2 }
  0xa9   : > { %v396_v4 = vsub.f32 %v1093_v0, %v395_v3 }
  0xab   : > { %v397_v5 = vmul.f32 %v396_v4, %v396_v4 }
  0xad   : > { %v398_v6 = vsel %vm388_vm0, %v397_v5, 0.0 }
  0xae   : > { %399 = vadd.xlane.f32.xlu0 %v398_v6 }
 0x137   : > { %v400_v10 = vpop.xlane.xlu0 %399 }
 0x138   : > { %v401_v11 = vmul.f32 0.03125, %v400_v10 }
 0x13a   : > { %v402_v12 = vadd.f32 1e-05, %v401_v11 }
 0x13c   : > { %898 = vrsqrt.f32 %v402_v12 }
 0x149   : > { %v899_v13 = vpop.eup %898 }
 0x14a   : > { %v404_v15 = vmul.f32 %v899_v13, %v396_v4 }
 0x14c   : > { %v412_v17 = vmul.f32 %v772_v14, %v404_v15 }
 0x14e   : > { %v420_v18 = vadd.f32 %v773_v16, %v412_v17 }
 0x150   : > { %v421_v19 = vpack.c.bf16 %v420_v18, %v420_v18 }
 0x152   : > { %423 = vst.msk [vmem:[#allocation2] sm:$0xf] %vm422_vm2, %v421_v19 }
 0x159   : > { %v424_v20 = vld [vmem:[#allocation2] sm:$0xf] }
 0x15a   : > { %808 = vmatmul.mubr.msk.bf16.vlgmr.msra.gmra.mxu0 %vm388_vm0, %v424_v20 }
 0x21a   : > { %v486_v30 = vpop.f32.mrf.mxu0 }
 0x21b   : > { %v487_v31 = vadd.f32 %v774_v29, %v486_v30 }
 0x21c   : > { %v809_v32 = vpop.f32.mrf.mxu0 }
 0x21d   : > { %v493_v33 = vmul.f32 0.044715, %v487_v31  ;;  %v492_v41 = vmul.f32 0.5, %v487_v31 }
 0x21e   : > { %v489_v34 = vpop.f32.mrf.mxu0 }
 0x21f   : > { %v494_v35 = vmul.f32 %v493_v33, %v487_v31 }
 0x220   : > { %v810_v36 = vpop.f32.mrf.mxu0 }
 0x221   : > { %v495_v37 = vmul.f32 %v494_v35, %v487_v31 }
 0x223   : > { %v496_v38 = vadd.f32 %v495_v37, %v487_v31 }
 0x225   : > { %v497_v39 = vmul.f32 0.7978846, %v496_v38 }
 0x227   : > { %900 = vtanh.f32 %v497_v39 }
 0x234   : > { %v901_v40 = vpop.eup %900 }
 0x235   : > { %v499_v42 = vadd.f32 1.0, %v901_v40 }
 0x237   : > { %v500_v43 = vmul.f32 %v499_v42, %v492_v41 }
 0x239   : > { %v502_v44 = vpack.c.bf16 %v500_v43, %v500_v43 }
 0x23b   : > { %828 = vmatmul.mubr.bf16.vlgmr.msra.gmra.mxu1 %v502_v44 }
 0x2fb   : > { %v601_v46 = vpop.f32.mrf.mxu1 }
 0x2fc   : > { %v607_v47 = vadd.f32 %v601_v46, %v501_v45 }
 0x2fd   : > { %v829_v48 = vpop.f32.mrf.mxu1 }
 0x2fe   : > { %608 = vst.msk [vmem:[#allocation3] sm:$0xff] %vm388_vm0, %v607_v47 }
 0x2ff   : > { %v604_v49 = vpop.f32.mrf.mxu1 }
 0x301   : > { %v830_v50 = vpop.f32.mrf.mxu1 }
 0x305   : > { %v612_v52 = vld [vmem:[#allocation3] sm:$0xff] }
 0x306   : > { %v620_v53 = vadd.f32 %v786_v51, %v612_v52 }
 0x308   : > { %v622_v55 = vadd.f32 %v620_v53, %v1093_v0 }
 0x30a   : > { %v624_v56 = vadd.f32 %v623_v54, %v622_v55 }
 0x30c   : > { %625 = vst.msk [vmem:[%s361_s12] sm:$0xff] %vm388_vm0, %v624_v56 }
 0x30d   : > { %915 = shalt.err (!%p912_p5)
}
 0x30e   : > { %s916_s0 = scalar_lea.hbm %s638_s22, 128  ;;  %s920_s24 = scalar_lea.hbm %s1198_s8, 256 }
 0x30f   : > { %p917_p6 = scmp.ne.s32.totalorder %s638_s22, %s916_s0  ;;  %p921_p10 = scmp.lt.s32.totalorder %s638_s22, %s1198_s8 }
 0x310   : > { %p922_p11 = scmp.lt.s32.totalorder %s920_s24, %s916_s0 }
 0x311   : > { %p918_p7 = pnand %p917_p6, %p1068_p4 }
 0x312   : > { %p923_p12 = por %p922_p11, %p921_p10 }
 0x313   : > { %p919_p9 = pneg %p918_p7 }
 0x315   : > { %p924_p13 = pnand %p923_p12, %p919_p9 }
 0x317   : > { %927 = shalt.err (!%p924_p13)
}
 0x318   : > { %831 = dma.vmem_to_hbm [thread:$0]  (%p1068_p4), %s641_s14, 128, %s638_s22, %s627_s19  }
 0x319 PF: > { %p837_p0 = scmp.ge.s32.totalorder %s978_s10, 2  ;;  %s652_s11 = sand.u32 1, %s958_s27  }
 0x31a   : > { %s653_s12 = scalar_lea.sflag [#allocation5], %s652_s11 }
 0x31b   : > { %p834_p1 = pnand %p837_p0, %p1075_p8 }
 0x31d   : > { %p835_p2 = pneg %p834_p1 }
 0x31f   : > { %953 = dma.done.wait (%p835_p2), %s653_s12, 128  }
 0x320   : > { %955 = vsyncadd (%p835_p2), %s653_s12, 4294967168  ;;  %s21_s10 = sadd.s32 1, %s978_s10   ;;  %s1205_s27 = smov %s962_s28 }
 0x321   : > { %p18_p3 = scmp.ge.s32.totalorder %s21_s10, 4   ;;  %s1206_s28 = smov %s966_s29 }
 0x322   : > { %s1207_s29 = smov %s1081_s18  ;;  %s1208_s30 = smov %s974_s9 }
 0x323   : > { %s1209_s9 = smov %s1211_s13  ;;  %20 = sbr.rel (!%p18_p3) target bundleno = 7 (0x7), region = 107 }
 0x328   :  { %658 = vsyncpa [#allocation5], 1 }
 0x329   :  { %660 = vsyncpa [#allocation5 + $0x1], 1 }

// kernel: gpt_neox_layer_pallas.4
= control target key start
LH: loop header
LB: loop body
LE: loop exit
PB: predicated region body
PF: predicated region fallthrough
CT: control target
= control target key end

     0   :  { %s946_s18 = smov 0   ;;  %s948_s19 = smov 0   ;;  %s1046_s0 = inlined_call_operand.vmem [shape: bf16[2,4,8,8], index: 0, kind: input, shape index: {}]   ;;  %s1047_s1 = inlined_call_operand.vmem [shape: bf16[2,4,8,8], index: 1, kind: input, shape index: {}]   ;;  %s1048_s2 = inlined_call_operand.vmem [shape: bf16[2,4,8,8], index: 2, kind: input, shape index: {}]   ;;  %s1049_s3 = inlined_call_operand.vmem [shape: bf16[4,8,32], index: 3, kind: input, shape index: {}]   ;;  %s1050_s4 = inlined_call_operand.vmem [shape: f32[1,32], index: 4, kind: input, shape index: {}]   ;;  %s1051_s5 = inlined_call_operand.vmem [shape: f32[2,8,32], index: 5, kind: output, shape index: {}]  }
   0x1   :  { %s950_s20 = smov 0   ;;  %s952_s21 = smov 0  }
   0x2   :  { %s954_s22 = smov 0  }
   0x3 LB: > { %s33_s23 = sadd.s32 1, %s901_s20  ;;  %s41_s24 = sadd.s32 1, %s905_s21  ;;  %s909_s22 = sphi %s954_s22, %s15_s22   ;;  %s905_s21 = sphi %s952_s21, %s1055_s21   ;;  %s901_s20 = sphi %s950_s20, %s1054_s20   ;;  %s897_s19 = sphi %s948_s19, %s1053_s19   ;;  %s893_s18 = sphi %s946_s18, %s1052_s18  }
   0x4   : > { %p35_p0 = scmp.ge.s32.totalorder %s33_s23, 4  ;;  %p775_p1 = scmp.ge.s32.totalorder %s909_s22, 1 }
   0x5   : > { %p274_p2 = scmp.lt.s32.totalorder %s909_s22, 9 }
   0x6   : > { %s1057_s23 = smov (%p35_p0, %s33_s23), 0  ;;  %s1059_s24 = smov (!%p35_p0, %s41_s24), %s905_s21 }
   0x7   : > { %p275_p3 = pnand %p775_p1, %p274_p2  ;;  %p43_p4 = scmp.ge.s32.totalorder %s1059_s24, 2 }
   0x8   : > { %p336_p5 = scmp.lt.s32.totalorder (!%p275_p3), %s897_s19, 1  ;;  %p338_p6 = scmp.lt.s32.totalorder (!%p275_p3), %s893_s18, 3 }
   0x9   : > { %s1061_s24 = smov (%p43_p4, %s1059_s24), 0  ;;  %278 = sbr.rel (%p275_p3) target bundleno = 1009 (0x3f1), region = 40 }
   0xa   : > { %p383_p7 = scmp.eq.s32.totalorder (!%p275_p3), %s893_s18, 0 }
   0xe   : > { %s1063_s19 = smov (!%p336_p5, %s897_s19), 1  ;;  %vm389_vm0 = vcmask (%p383_p7), 261120   ;;  %v911_v0 = vmov (%p383_p7), 0.0  }
   0xf   : > { %s339_s25 = scalar_select %p338_p6, %s893_s18, 3  ;;  %390 = vst.msk [vmem:[#allocation5] sm:$0xff] (%p383_p7), %vm389_vm0, %v911_v0 }
  0x10   : > { %s776_s26 = sshll.u32 %s1063_s19, 2  ;;  %s783_s27 = sshll.u32 %s1063_s19, 3 }
  0x11   : > { %s344_s28 = sadd.s32 %s776_s26, %s339_s25  ;;  %s782_s29 = sshll.u32 %s339_s25, 2 }
  0x12   : > { %s981_s30 = sshll.u32 %s344_s28, 2  ;;  %s986_s8 = scalar_lea.vmem %s1049_s3, %s782_s29 }
  0x13   : > { %s346_s11 = scalar_lea.vmem %s1046_s0, %s981_s30  ;;  %s357_s14 = scalar_lea.vmem %s1047_s1, %s981_s30 }
  0x14   : > { %s368_s17 = scalar_lea.vmem %s1048_s2, %s981_s30  ;;  %s1003_s26 = scalar_lea.vmem %s1051_s5, %s783_s27 }
  0x15   : > { %388 = sbr.rel (!%p383_p7) target bundleno = 26 (0x1a), region = 44 }
  0x1a PF: > { %vm397_vm1 = vcmask 64512   ;;  %v405_v1 = vld [vmem:[%s357_s14] sm:$0xf]  ;;  %v912_v2 = vmov 0.0   ;;  %vm913_vm2 = vmmov 0   ;;  %v453_v5 = vlaneseq  ;;  %p612_p8 = scmp.eq.s32.totalorder %s893_s18, 3 }
  0x1b   : > { %800 = vmatprep.subr.bf16.mxu0 %v912_v2  ;;  %398 = vst.msk [vmem:[#allocation4] sm:$0xff] %vm397_vm1, %v912_v2  ;;  %v411_v3 = vsel %vm397_vm1, %v405_v1, 0  ;;  %802 = vmatprep.mubr.msk.bf16.mxu0 %vm913_vm2, %v912_v2  ;;  %v404_v4 = vld [vmem:[%s346_s11] sm:$0xf]  ;;  %vm394_vm4 = vcmask 7168   ;;  %v915_v15 = vmov 0  }
  0x1c   : > { %801 = vmatpush3.bf16.xpose.msra.mxu0 %v411_v3  ;;  %806 = vmatprep.subr.bf16.mxu1 %v912_v2  ;;  %v454_v6 = vshrl.u32 %v453_v5, 7  ;;  %v458_v7 = vand.u32 127, %v453_v5  ;;  %v914_v13 = vmov -1e+30   ;;  %396 = vst.msk [vmem:[#allocation3] sm:$0xff] %vm394_vm4, %v912_v2  ;;  %vm499_vm5 = vcmask 1043456  }
  0x1d   : > { %808 = vmatprep.mubr.msk.bf16.mxu1 %vm913_vm2, %v912_v2  ;;  %395 = vst.msk [vmem:[#allocation2] sm:$0xff] %vm394_vm4, %v914_v13  ;;  %863 = vset.pattern.permute.xlu0 %v915_v15  ;;  %v495_v20 = vld [vmem:[%s368_s17] sm:$0xf]  ;;  %v558_v50 = vld [vmem:[#allocation5] sm:$0xff]  ;;  %vm610_vm6 = vcmask 261120  }
  0x1e   : > { %vm461_vm3 = vcmp.gt.s32.totalorder %v458_v7, %v454_v6  ;;  %864 = vset.pattern.permute.xlu1 %v915_v15  ;;  %v501_v21 = vsel %vm499_vm5, %v495_v20, 0  ;;  %v560_v25 = vld [vmem:[%s986_s8] sm:$0xf] }
  0x1f   : > { %807 = vmatpush3.bf16.msra.mxu1 %v501_v21  ;;  %v567_v28 = vsel %vm499_vm5, %v560_v25, 0  ;;  %v789_v57 = vld [vmem:[%s1050_s4] ss:$0 sm:$0xff] (%p612_p8) }
  0x20   : > { %812 = vmatprep.subr.bf16.mxu1 %v912_v2 }
  0x22   : > { %v487_v38 = vld [vmem:[#allocation4] sm:$0xff] }
  0x23   : > { %803 = vmatmul.mubr.msk.bf16.vlgmr.msra.gmra.mxu0 %vm397_vm1, %v404_v4  ;;  %v479_v32 = vld [vmem:[#allocation3] sm:$0xff] }
  0x24   : > { %v463_v16 = vld [vmem:[#allocation2] sm:$0xff] }
  0xe3   : > { %v447_v8 = vpop.f32.mrf.mxu0 }
  0xe4   : > { %v462_v9 = vsel %vm461_vm3, -1e+30, %v447_v8 }
  0xe5   : > { %v804_v10 = vpop.f32.mrf.mxu0  ;;  %v464_v11 = vsel %vm397_vm1, %v462_v9, -inf }
  0xe6   : > { %465 = vmax.xlane.f32.xlu0 %v464_v11 }
  0xe7   : > { %v450_v12 = vpop.f32.mrf.mxu0 }
  0xe9   : > { %v805_v14 = vpop.f32.mrf.mxu0 }
 0x16f   : > { %v466_v17 = vpop.xlane.xlu0 %465 }
 0x170   : > { %v467_v18 = vmax.f32 %v463_v16, %v466_v17 }
 0x172   : > { %v468_v19 = vsub.f32 %v463_v16, %v467_v18  ;;  %545 = vst.msk [vmem:[#allocation2] sm:$0xff] %vm394_vm4, %v467_v18  ;;  %473 = vperm.xlu0 %863, %v467_v18  }
 0x174   : > { %v469_v27 = vmul.f32 1.442695, %v468_v19 }
 0x1ed   : > { %v474_v22 = vpop.permute.xlu0 %473 }
 0x1ee   : > { %v476_v23 = vsub.f32 %v462_v9, %v474_v22 }
 0x1f0   : > { %v477_v24 = vmul.f32 1.442695, %v476_v23 }
 0x1f2   : > { %865 = vpow2.f32 %v477_v24 }
 0x1f3   : > { %867 = vpow2.f32 %v469_v27 }
 0x1ff   : > { %v866_v26 = vpop.eup %865 }
 0x200   : > { %v481_v29 = vsel %vm397_vm1, %v866_v26, 0.0  ;;  %v494_v30 = vpack.c.bf16 %v866_v26, %v866_v26  ;;  %v868_v31 = vpop.eup %867 }
 0x201   : > { %482 = vadd.xlane.f32.xlu1 %v481_v29  ;;  %v480_v33 = vmul.f32 %v868_v31, %v479_v32 }
 0x202   : > { %809 = vmatmul.mubr.msk.bf16.vlgmr.msra.gmra.mxu1 %vm397_vm1, %v494_v30 }
 0x203   : > { %813 = vmatpush3.bf16.msra.mxu1 %v567_v28  ;;  %814 = vmatprep.mubr.msk.bf16.mxu1 %vm913_vm2, %v912_v2 }
 0x212   : > { %490 = vperm.xlu1 %864, %v868_v31  }
 0x28a   : > { %v483_v34 = vpop.xlane.xlu1 %482 }
 0x28b   : > { %v484_v35 = vadd.f32 %v483_v34, %v480_v33 }
 0x28d   : > { %486 = vst.msk [vmem:[#allocation3] sm:$0xff] %vm394_vm4, %v484_v35 }
 0x28e   : > { %v491_v39 = vpop.permute.xlu1 %490 }
 0x28f   : > { %v493_v40 = vmul.f32 %v491_v39, %v487_v38 }
 0x294   : > { %v550_v36 = vld [vmem:[#allocation3] sm:$0xff] }
 0x295   : > { %869 = vrcp.f32 %v550_v36 }
 0x2a2   : > { %v870_v37 = vpop.eup %869 }
 0x2a3   : > { %554 = vperm.xlu1 %864, %v870_v37  }
 0x2c2   : > { %v537_v41 = vpop.f32.mrf.mxu1 }
 0x2c3   : > { %v543_v42 = vadd.f32 %v537_v41, %v493_v40 }
 0x2c4   : > { %v810_v43 = vpop.f32.mrf.mxu1 }
 0x2c5   : > { %544 = vst.msk [vmem:[#allocation4] sm:$0xff] %vm397_vm1, %v543_v42 }
 0x2c6   : > { %v540_v44 = vpop.f32.mrf.mxu1 }
 0x2c8   : > { %v811_v45 = vpop.f32.mrf.mxu1 }
 0x2cc   : > { %v549_v46 = vld [vmem:[#allocation4] sm:$0xff] }
 0x31e   : > { %v555_v47 = vpop.permute.xlu1 %554 }
 0x31f   : > { %v557_v48 = vmul.f32 %v555_v47, %v549_v46 }
 0x321   : > { %v559_v49 = vpack.c.bf16 %v557_v48, %v557_v48 }
 0x323   : > { %815 = vmatmul.mubr.msk.bf16.vlgmr.msra.gmra.mxu1 %vm397_vm1, %v559_v49 }
 0x3e3   : > { %v603_v51 = vpop.f32.mrf.mxu1 }
 0x3e4   : > { %v609_v52 = vadd.f32 %v603_v51, %v558_v50 }
 0x3e5   : > { %v816_v53 = vpop.f32.mrf.mxu1  ;;  %616 = sbr.rel (!%p612_p8) target bundleno = 1009 (0x3f1), region = 60 }
 0x3e6   : > { %611 = vst.msk [vmem:[#allocation5] sm:$0xff] %vm610_vm6, %v609_v52 }
 0x3e7   : > { %v606_v54 = vpop.f32.mrf.mxu1 }
 0x3e9   : > { %v817_v55 = vpop.f32.mrf.mxu1 }
 0x3ed   : > { %v617_v56 = vld [vmem:[#allocation5] sm:$0xff] }
 0x3ee   : > { %v625_v58 = vadd.f32 %v789_v57, %v617_v56 }
 0x3f0   : > { %627 = vst.msk [vmem:[%s1003_s26] sm:$0xff] %vm610_vm6, %v625_v58 }
 0x3f1 PF: > { %s15_s22 = sadd.s32 1, %s909_s22   ;;  %s1052_s18 = smov %s901_s20 }
 0x3f2   : > { %p12_p9 = scmp.ge.s32.totalorder %s15_s22, 10   ;;  %s1053_s19 = smov %s905_s21 }
 0x3f3   : > { %s1054_s20 = smov %s1057_s23  ;;  %s1055_s21 = smov %s1061_s24 }
 0x3f4   :  { %14 = sbr.rel (!%p12_p9) target bundleno = 3 (0x3), region = 99 }

// kernel: gpt_neox_layer_pallas.3
= control target key start
LH: loop header
LB: loop body
LE: loop exit
PB: predicated region body
PF: predicated region fallthrough
CT: control target
= control target key end

     0   :  { %s1682_s29 = smov 0   ;;  %s1684_s30 = smov 0   ;;  %s1857_s0 = inlined_call_operand.vmem [shape: f32[2,8,32], index: 0, kind: input, shape index: {}]   ;;  %s1858_s1 = inlined_call_operand.vmem [shape: f32[1,32], index: 1, kind: input, shape index: {}]   ;;  %s1859_s2 = inlined_call_operand.vmem [shape: f32[1,32], index: 2, kind: input, shape index: {}]   ;;  %s1860_s3 = inlined_call_operand.vmem [shape: bf16[4,32,8], index: 3, kind: input, shape index: {}]   ;;  %s1861_s4 = inlined_call_operand.vmem [shape: bf16[4,32,8], index: 4, kind: input, shape index: {}]   ;;  %s1862_s5 = inlined_call_operand.vmem [shape: bf16[4,32,8], index: 5, kind: input, shape index: {}]   ;;  %s1863_s6 = inlined_call_operand.vmem [shape: f32[4,1,8], index: 6, kind: input, shape index: {}]   ;;  %s1864_s7 = inlined_call_operand.vmem [shape: f32[4,1,8], index: 7, kind: input, shape index: {}]   ;;  %s1865_s8 = inlined_call_operand.vmem [shape: f32[4,1,8], index: 8, kind: input, shape index: {}]   ;;  %s1866_s9 = inlined_call_operand.vmem [shape: f32[2,8,8], index: 9, kind: input, shape index: {}]   ;;  %s1867_s10 = inlined_call_operand.vmem [shape: f32[2,8,8], index: 10, kind: input, shape index: {}]   ;;  %s1868_s11 = inlined_call_operand.vmem [shape: f32[8,8], index: 11, kind: input, shape index: {}]   ;;  %s1869_s12 = inlined_call_operand.vmem [shape: bf16[2,4,8,8], index: 12, kind: output, shape index: {0}]   ;;  %s1870_s13 = inlined_call_operand.vmem [shape: bf16[2,4,8,8], index: 13, kind: output, shape index: {1}]   ;;  %s1871_s14 = inlined_call_operand.vmem [shape: bf16[2,4,8,8], index: 14, kind: output, shape index: {2}]  }
   0x1   :  { %1877 = sst [smem:[#allocation10_spill]] %s1857_s0  ;;  %s1686_s15 = smov 0  }
   0x2   :  { %1878 = sst [smem:[#allocation11_spill]] %s1858_s1  ;;  %s1688_s16 = smov 0  }
   0x3   :  { %1879 = sst [smem:[#allocation12_spill]] %s1859_s2  ;;  %s1690_s17 = smov 0  }
   0x4   :  { %1880 = sst [smem:[#allocation13_spill]] %s1860_s3 }
   0x5   :  { %1881 = sst [smem:[#allocation14_spill]] %s1861_s4 }
   0x6   :  { %1882 = sst [smem:[#allocation15_spill]] %s1862_s5 }
   0x7   :  { %1883 = sst [smem:[#allocation16_spill]] %s1868_s11 }
   0x8 LB: > { %1884 = sst [smem:[#allocation3_spill]] %s1595_s15  ;;  %s37_s18 = sadd.s32 1, %s1595_s15  ;;  %s1603_s17 = sphi %s1690_s17, %s25_s17   ;;  %s1599_s16 = sphi %s1688_s16, %s1905_s16   ;;  %s1595_s15 = sphi %s1686_s15, %s1904_s15   ;;  %s1591_s30 = sphi %s1684_s30, %s1903_s30   ;;  %s1587_s29 = sphi %s1682_s29, %s1902_s29  }
   0x9   : > { %1885 = sst [smem:[#allocation4_spill]] %s1599_s16  ;;  %s44_s19 = sadd.s32 1, %s1599_s16 }
   0xa   : > { %1886 = sst [smem:[#allocation5_spill]] %s1603_s17  ;;  %p38_p0 = scmp.ge.s32.totalorder %s37_s18, 4 }
   0xb   : > { %p1430_p1 = scmp.ge.s32.totalorder %s1603_s17, 1  ;;  %p534_p2 = scmp.lt.s32.totalorder %s1603_s17, 9 }
   0xc   : > { %s1907_s18 = smov (%p38_p0, %s37_s18), 0  ;;  %s1909_s19 = smov (!%p38_p0, %s44_s19), %s1599_s16 }
   0xd   : > { %1887 = sst [smem:[#allocation6_spill]] %s1907_s18  ;;  %p535_p3 = pnand %p1430_p1, %p534_p2 }
   0xe   : > { %p46_p4 = scmp.ge.s32.totalorder %s1909_s19, 2 }
   0xf   : > { %538 = sbr.rel (%p535_p3) target bundleno = 763 (0x2fb), region = 68 }
  0x10   : > { %s1911_s19 = smov (%p46_p4, %s1909_s19), 0 }
  0x11   : > { %1888 = sst [smem:[#allocation7_spill]] %s1911_s19 }
  0x14   : > { %p648_p5 = scmp.lt.s32.totalorder %s1591_s30, 1  ;;  %p655_p6 = scmp.lt.s32.totalorder %s1587_s29, 3 }
  0x15   : > { %s1889_s0 = sld [smem:[#allocation10_spill]]  ;;  %p1446_p7 = scmp.ne.s32.totalorder %s1587_s29, 0 }
  0x16   : > { %s1913_s30 = smov (!%p648_p5, %s1591_s30), 1  ;;  %s1890_s3 = sld [smem:[#allocation13_spill]] }
  0x17   : > { %s1716_s20 = scalar_select %p655_p6, %s1587_s29, 3 }
  0x18   : > { %s1718_s21 = sshll.u32 %s1913_s30, 3  ;;  %s1440_s22 = sshll.u32 %s1913_s30, 2 }
  0x19   : > { %s1465_s26 = sshll.u32 %s1716_s20, 4  ;;  %s1892_s4 = sld [smem:[#allocation14_spill]] }
  0x1a   : > { %s1894_s5 = sld [smem:[#allocation15_spill]]  ;;  %s672_s23 = scalar_lea.vmem %s1863_s6, %s1716_s20 }
  0x1b   : > { %s654_s25 = scalar_lea.vmem %s1889_s0, %s1718_s21  ;;  %s675_s27 = scalar_lea.vmem %s1864_s7, %s1716_s20 }
  0x1c   : > { %s1728_s19 = scalar_lea.vmem %s1890_s3, %s1465_s26  ;;  %s692_s17 = scalar_lea.vmem %s1867_s10, %s1718_s21 }
  0x1d   : > { %1891 = sst [smem:[#allocation8_spill]] %s1728_s19  ;;  %s678_s19 = scalar_lea.vmem %s1865_s8, %s1716_s20 }
  0x1e   : > { %s1895_s11 = sld [smem:[#allocation11_spill]] (!%p1446_p7) }
  0x1f   : > { %s1733_s15 = scalar_lea.vmem %s1892_s4, %s1465_s26 }
  0x20   : > { %1893 = sst [smem:[#allocation9_spill]] %s1733_s15  ;;  %s1738_s2 = scalar_lea.vmem %s1894_s5, %s1465_s26 }
  0x21   : > { %s701_s26 = sadd.s32 %s1440_s22, %s1716_s20  ;;  %730 = sbr.rel (%p1446_p7) target bundleno = 350 (0x15e), region = 72 }
  0x22   : > { %s1761_s5 = sshll.u32 %s701_s26, 2  ;;  %s1896_s26 = sld [smem:[#allocation12_spill]] (!%p1446_p7) }
  0x23   : > { %s703_s0 = scalar_lea.vmem %s1869_s12, %s1761_s5  ;;  %s714_s28 = scalar_lea.vmem %s1870_s13, %s1761_s5 }
  0x24   : > { %s725_s4 = scalar_lea.vmem %s1871_s14, %s1761_s5 }
  0x26   : > { %v731_v0 = vld [vmem:[%s654_s25] sm:$0xff]  ;;  %vm732_vm0 = vcmask 261120   ;;  %vm764_vm1 = vcmask 257024  }
  0x27   : > { %v733_v1 = vsel %vm732_vm0, %v731_v0, 0.0  ;;  %v1447_v11 = vld [vmem:[%s1895_s11] ss:$0 sm:$0xff] }
  0x28   : > { %734 = vadd.xlane.f32.xlu0 %v733_v1  ;;  %v1448_v13 = vld [vmem:[%s1896_s26] ss:$0 sm:$0xff] }
  0xb1   : > { %v735_v2 = vpop.xlane.xlu0 %734 }
  0xb2   : > { %v737_v3 = vmul.f32 0.03125, %v735_v2 }
  0xb4   : > { %v738_v4 = vsub.f32 %v731_v0, %v737_v3 }
  0xb6   : > { %v739_v5 = vmul.f32 %v738_v4, %v738_v4 }
  0xb8   : > { %v740_v6 = vsel %vm732_vm0, %v739_v5, 0.0 }
  0xb9   : > { %741 = vadd.xlane.f32.xlu0 %v740_v6 }
 0x142   : > { %v742_v7 = vpop.xlane.xlu0 %741 }
 0x143   : > { %v743_v8 = vmul.f32 0.03125, %v742_v7 }
 0x145   : > { %v744_v9 = vadd.f32 1e-05, %v743_v8 }
 0x147   : > { %1557 = vrsqrt.f32 %v744_v9 }
 0x154   : > { %v1558_v10 = vpop.eup %1557 }
 0x155   : > { %v746_v12 = vmul.f32 %v1558_v10, %v738_v4 }
 0x157   : > { %v754_v14 = vmul.f32 %v1447_v11, %v746_v12 }
 0x159   : > { %v762_v15 = vadd.f32 %v1448_v13, %v754_v14 }
 0x15b   : > { %v763_v16 = vpack.c.bf16 %v762_v15, %v762_v15 }
 0x15d   : > { %765 = vst.msk [vmem:[#allocation2] sm:$0xf] %vm764_vm1, %v763_v16 }
 0x15e PF: > { %s1897_s1 = sld [smem:[#allocation8_spill]]  ;;  %v1605_v18 = vmov 0.0   ;;  %vm1606_vm2 = vmmov 0   ;;  %vm790_vm3 = vcmask 261120   ;;  %v1563_v23 = vld [vmem:[%s1738_s2 + $0x8] sm:$0xff]   ;;  %v1564_v25 = vld [vmem:[%s1738_s2] sm:$0xff]  }
 0x15f   : > { %s1898_s30 = sld [smem:[#allocation9_spill]]  ;;  %1481 = vmatprep.subr.bf16.mxu0 %v1605_v18  ;;  %1489 = vmatprep.subr.bf16.mxu1 %v1605_v18  ;;  %v1449_v26 = vld [vmem:[%s672_s23] ss:$0 sm:$0xff]  ;;  %vm964_vm4 = vcmask 64512   ;;  %vm1117_vm5 = vcmask 60416  }
 0x160   : > { %1485 = vmatprep.mubr.msk.bf16.mxu0 %vm1606_vm2, %v1605_v18  ;;  %1493 = vmatprep.mubr.msk.bf16.mxu1 %vm1606_vm2, %v1605_v18  ;;  %s1899_s16 = sld [smem:[#allocation16_spill]]  ;;  %v1453_v28 = vld [vmem:[%s675_s27] ss:$0 sm:$0xff] }
 0x161   : > { %v1457_v37 = vld [vmem:[%s678_s19] ss:$0 sm:$0xff]  ;;  %s1900_s19 = scalar_lea.vmem %s1866_s9, %s1718_s21 }
 0x162   : > { %v960_v45 = vld [vmem:[%s1900_s19] sm:$0xff] }
 0x163   : > { %v961_v46 = vld [vmem:[%s692_s17] sm:$0xff] }
 0x164   : > { %v1559_v17 = vld [vmem:[%s1897_s1 + $0x8] sm:$0xff]   ;;  %v1561_v20 = vld [vmem:[%s1897_s1] sm:$0xff]  }
 0x165   : > { %v1560_v19 = vld [vmem:[%s1898_s30 + $0x8] sm:$0xff]   ;;  %1482 = vmatpush3.bf16.msra.mxu0 %v1559_v17  ;;  %v1562_v21 = vld [vmem:[%s1898_s30] sm:$0xff]  }
 0x166   : > { %1490 = vmatpush3.bf16.msra.mxu1 %v1560_v19  ;;  %1483 = vmatprep.subr.bf16.mxu0 %v1605_v18  ;;  %v766_v22 = vld [vmem:[#allocation2] sm:$0xf] }
 0x167   : > { %1491 = vmatprep.subr.bf16.mxu1 %v1605_v18  ;;  %v962_v24 = vld [vmem:[%s1899_s16] sm:$0xff] }
 0x169   : > { %1484 = vmatpush3.bf16.msra.mxu0 %v1561_v20 }
 0x16a   : > { %1492 = vmatpush3.bf16.msra.mxu1 %v1562_v21  ;;  %1497 = vmatprep.subr.bf16.mxu0 %v1605_v18 }
 0x16b   : > { %1505 = vmatprep.subr.mxu1 %v1605_v18 }
 0x16c   : > { %1486 = vmatmul.mubr.msk.bf16.vlgmr.msra.gmra.mxu0 %vm790_vm3, %v766_v22 }
 0x16d   : > { %1494 = vmatmul.mubr.msk.bf16.vlgmr.msra.gmra.mxu1 %vm790_vm3, %v766_v22  ;;  %1498 = vmatpush3.bf16.msra.mxu0 %v1563_v23 }
 0x16e   : > { %1506 = vmatpush3.msra.mxu1 %v962_v24  ;;  %1499 = vmatprep.subr.bf16.mxu0 %v1605_v18 }
 0x16f   : > { %1501 = vmatprep.mubr.msk.bf16.mxu0 %vm1606_vm2, %v1605_v18  ;;  %1507 = vmatprep.mubr.msk.f32.mxu1 %vm1606_vm2, %v1605_v18 }
 0x170   : > { %1510 = vmatprep.subr.mxu1 %v1605_v18 }
 0x171   : > { %1500 = vmatpush3.bf16.msra.mxu0 %v1564_v25 }
 0x174   : > { %1502 = vmatmul.mubr.msk.bf16.vlgmr.msra.gmra.mxu0 %vm790_vm3, %v766_v22 }
 0x22c   : > { %v828_v27 = vpop.f32.mrf.mxu0 }
 0x22d   : > { %v829_v29 = vadd.f32 %v1449_v26, %v828_v27  ;;  %v891_v30 = vpop.f32.mrf.mxu1 }
 0x22e   : > { %v1487_v31 = vpop.f32.mrf.mxu0  ;;  %v892_v32 = vadd.f32 %v1453_v28, %v891_v30 }
 0x22f   : > { %v1495_v33 = vpop.f32.mrf.mxu1  ;;  %1508 = vmatmul.mubr.msk.f32.vlgmr.msra.gmra.mxu1 %vm964_vm4, %v829_v29  ;;  %v963_v48 = vmul.f32 %v960_v45, %v829_v29 }
 0x230   : > { %1511 = vmatpush3.msra.mxu1 %v962_v24  ;;  %v831_v34 = vpop.f32.mrf.mxu0  ;;  %1512 = vmatprep.mubr.msk.f32.mxu1 %vm1606_vm2, %v1605_v18  ;;  %v1040_v53 = vmul.f32 %v960_v45, %v892_v32 }
 0x231   : > { %v894_v35 = vpop.f32.mrf.mxu1 }
 0x232   : > { %v1488_v36 = vpop.f32.mrf.mxu0 }
 0x233   : > { %v1496_v38 = vpop.f32.mrf.mxu1  ;;  %1513 = vmatmul.mubr.msk.f32.vlgmr.msra.gmra.mxu1 %vm964_vm4, %v892_v32 }
 0x234   : > { %v954_v39 = vpop.f32.mrf.mxu0 }
 0x235   : > { %v955_v40 = vadd.f32 %v1457_v37, %v954_v39 }
 0x236   : > { %v1503_v41 = vpop.f32.mrf.mxu0 }
 0x237   : > { %v1121_v42 = vpack.c.bf16 %v955_v40, %v955_v40 }
 0x238   : > { %v957_v43 = vpop.f32.mrf.mxu0 }
 0x239   : > { %1122 = vst.msk [vmem:[%s725_s4] sm:$0xf] %vm1117_vm5, %v1121_v42 }
 0x23a   : > { %v1504_v44 = vpop.f32.mrf.mxu0 }
 0x2ef   : > { %v1034_v47 = vpop.f32.mrf.mxu1 }
 0x2f0   : > { %v1038_v49 = vmul.f32 %v1034_v47, %v961_v46 }
 0x2f1   : > { %v1509_v50 = vpop.f32.mrf.mxu1 }
 0x2f2   : > { %v1039_v51 = vadd.f32 %v1038_v49, %v963_v48 }
 0x2f3   : > { %v1110_v52 = vpop.f32.mrf.mxu1 }
 0x2f4   : > { %v1116_v54 = vpack.c.bf16 %v1039_v51, %v1039_v51  ;;  %v1114_v55 = vmul.f32 %v1110_v52, %v961_v46 }
 0x2f5   : > { %v1514_v56 = vpop.f32.mrf.mxu1 }
 0x2f6   : > { %1118 = vst.msk [vmem:[%s703_s0] sm:$0xf] %vm1117_vm5, %v1116_v54  ;;  %v1115_v57 = vadd.f32 %v1114_v55, %v1040_v53 }
 0x2f8   : > { %v1119_v58 = vpack.c.bf16 %v1115_v57, %v1115_v57 }
 0x2fa   : > { %1120 = vst.msk [vmem:[%s714_s28] sm:$0xf] %vm1117_vm5, %v1119_v58 }
 0x2fb PF: > { %s1901_s3 = sld [smem:[#allocation5_spill]] }
 0x2fc   : > { %s1902_s29 = sld [smem:[#allocation3_spill]] }
 0x2fd   : > { %s1903_s30 = sld [smem:[#allocation4_spill]] }
 0x2fe   : > { %s1904_s15 = sld [smem:[#allocation6_spill]] }
 0x2ff   : > { %s1905_s16 = sld [smem:[#allocation7_spill]] }
 0x301   : > { %s25_s17 = sadd.s32 1, %s1901_s3  }
 0x302   : > { %p22_p8 = scmp.ge.s32.totalorder %s25_s17, 10  }
 0x304   :  { %24 = sbr.rel (!%p22_p8) target bundleno = 8 (0x8), region = 150 }

</bundles_post_ra>
